<compile_context>
chip_gen: v6e
topology: v6e:2x2x1
jax: 0.10.0
libtpu: 0.0.40
codegen_flags: <defaults>
</compile_context>

<pallas_src>
import functools
import math

import numpy as np
import jax
import jax.numpy as jnp
from jax.experimental import pallas as pl
from jax.experimental.pallas import tpu as pltpu

_VMEM_LIMIT = 64 * 1024 * 1024   # <= physical VMEM on v5e/v6e/v7x


# ----------------------------- tiling helpers -----------------------------

def _pick_layer_tile(num_patches, seq, target_rows=256):
    """Patches per row-tile: tn | num_patches, tn*seq % 8 == 0, tn*seq <= target.
    Prefers >=2 grid steps (megacore) when a proper divisor exists."""
    valid = [t for t in range(1, num_patches)
             if num_patches % t == 0 and (t * seq) % 8 == 0]
    fitting = [t for t in valid if t * seq <= target_rows]
    if fitting:
        return max(fitting)
    if valid:
        return min(valid)
    return num_patches


def _largest_divisor_at_most(n, target):
    target = max(1, min(n, target))
    for d in range(target, 0, -1):
        if n % d == 0:
            return d
    return 1


# ----------------------------- Pallas kernels -----------------------------

def _patch_embed_kernel(p_ref, w_ref, b_ref, pos_ref, o_ref):
    # (rows, C*P*P) bf16 @ (C*P*P, D) bf16 -> f32, + bias + positional rows.
    y = jnp.dot(p_ref[...], w_ref[...], preferred_element_type=jnp.float32)
    o_ref[...] = (y + b_ref[...] + pos_ref[...]).astype(o_ref.dtype)


def patch_embed(patches, w, b, pos_rep, rows):
    """patches: (Np*S, CPP) bf16 -> (Np*S, D) bf16, row-tiled."""
    M, CPP = patches.shape
    D = w.shape[1]
    return pl.pallas_call(
        _patch_embed_kernel,
        out_shape=jax.ShapeDtypeStruct((M, D), jnp.bfloat16),
        grid=(M // rows,),
        in_specs=[pl.BlockSpec((rows, CPP), lambda i: (i, 0)),
                  pl.BlockSpec((CPP, D), lambda i: (0, 0)),
                  pl.BlockSpec((1, D), lambda i: (0, 0)),
                  pl.BlockSpec((rows, D), lambda i: (i, 0))],
        out_specs=pl.BlockSpec((rows, D), lambda i: (i, 0)),
        compiler_params=pltpu.CompilerParams(
            dimension_semantics=("parallel",), vmem_limit_bytes=_VMEM_LIMIT),
    )(patches, w, b, pos_rep)


def _layer_norm(y, g, b, eps=1e-5):
    # Single-pass: var = E[y^2] - mean^2 (biased, matches torch LayerNorm).
    mu = jnp.mean(y, axis=-1, keepdims=True)
    var = jnp.mean(y * y, axis=-1, keepdims=True) - mu * mu
    return (y - mu) * jax.lax.rsqrt(var + eps) * g + b


def _encoder_layer_kernel(x_ref, mask_ref, wqkv_ref, bqkv_ref, wo_ref, bo_ref,
                          g1_ref, b1_ref, w1_ref, bf1_ref, w2_ref, bf2_ref,
                          g2_ref, b2_ref, o_ref, *, num_heads, scale):
    tm, D = x_ref.shape
    dh = D // num_heads

    x = x_ref[...]                                    # (tm, D) bf16
    x_f32 = x.astype(jnp.float32)
    mask = mask_ref[...]                              # (tm, tm) f32 additive mask

    # QKV projection: one lane-dense bf16 MXU matmul with f32 accumulation.
    qkv = jnp.dot(x, wqkv_ref[...], preferred_element_type=jnp.float32)
    qkv = qkv + bqkv_ref[...]                         # (tm, 3D) f32

    # Block-diagonal self-attention: rows are (patch n, seq s) with s minor;
    # tokens attend only within their own patch group (seq = image batch).
    heads = []
    for hh in range(num_heads):
        q = qkv[:, hh * dh:(hh + 1) * dh].astype(jnp.bfloat16)
        k = qkv[:, D + hh * dh:D + (hh + 1) * dh].astype(jnp.bfloat16)
        v = qkv[:, 2 * D + hh * dh:2 * D + (hh + 1) * dh].astype(jnp.bfloat16)
        s = jax.lax.dot_general(q, k, (((1,), (1,)), ((), ())),
                                preferred_element_type=jnp.float32)
        s = s * scale + mask
        s = s - jnp.max(s, axis=-1, keepdims=True)
        p = jnp.exp(s)
        p = p * pl.reciprocal(jnp.sum(p, axis=-1, keepdims=True), approx=True)
        heads.append(jnp.dot(p.astype(jnp.bfloat16), v,
                             preferred_element_type=jnp.float32))
    attn = jnp.concatenate(heads, axis=-1)            # (tm, D) f32

    # out-projection + residual + LayerNorm1 (post-norm, f32 math).
    y = jnp.dot(attn.astype(jnp.bfloat16), wo_ref[...],
                preferred_element_type=jnp.float32) + bo_ref[...] + x_f32
    h1 = _layer_norm(y, g1_ref[...], b1_ref[...])

    # MLP: ff1 + ReLU, ff2 + residual + LayerNorm2 (residual kept in f32).
    ff = jnp.dot(h1.astype(jnp.bfloat16), w1_ref[...],
                 preferred_element_type=jnp.float32) + bf1_ref[...]
    ff = jnp.maximum(ff, 0.0)
    y2 = jnp.dot(ff.astype(jnp.bfloat16), w2_ref[...],
                 preferred_element_type=jnp.float32) + bf2_ref[...] + h1
    o_ref[...] = _layer_norm(y2, g2_ref[...], b2_ref[...]).astype(o_ref.dtype)


def encoder_layer(h, mask, lp, *, num_heads, scale, rows):
    """Fused TransformerEncoderLayer on a (Np*S, D) bf16 slab, row-tiled."""
    M, D = h.shape
    mlp = lp["ff1_w"].shape[1]
    row_spec = pl.BlockSpec((rows, D), lambda i: (i, 0))

    def full(shape):
        return pl.BlockSpec(shape, lambda i: (0, 0))

    return pl.pallas_call(
        functools.partial(_encoder_layer_kernel, num_heads=num_heads, scale=scale),
        out_shape=jax.ShapeDtypeStruct((M, D), h.dtype),
        grid=(M // rows,),
        in_specs=[row_spec,
                  full((rows, rows)),
                  full((D, 3 * D)), full((1, 3 * D)),
                  full((D, D)), full((1, D)),
                  full((1, D)), full((1, D)),
                  full((D, mlp)), full((1, mlp)),
                  full((mlp, D)), full((1, D)),
                  full((1, D)), full((1, D))],
        out_specs=row_spec,
        compiler_params=pltpu.CompilerParams(
            dimension_semantics=("parallel",), vmem_limit_bytes=_VMEM_LIMIT),
    )(h, mask, lp["in_proj_w"], lp["in_proj_b"], lp["out_proj_w"], lp["out_proj_b"],
      lp["ln1_g"], lp["ln1_b"], lp["ff1_w"], lp["ff1_b"],
      lp["ff2_w"], lp["ff2_b"], lp["ln2_g"], lp["ln2_b"])


def _pool_classifier_kernel(x_ref, w_ref, b_ref, o_ref, acc_ref, *, inv_n):
    @pl.when(pl.program_id(0) == 0)
    def _init():
        acc_ref[...] = jnp.zeros_like(acc_ref)

    # accumulate the per-seq sum over patches for this patch tile
    acc_ref[...] += jnp.sum(x_ref[...].astype(jnp.float32), axis=0)

    @pl.when(pl.program_id(0) == pl.num_programs(0) - 1)
    def _finalize():
        pooled = (acc_ref[...] * inv_n).astype(jnp.bfloat16)           # (S, D)
        o_ref[...] = jnp.dot(pooled, w_ref[...],
                             preferred_element_type=jnp.float32) + b_ref[...]


def pool_classifier(h3, w_pad, b_pad):
    """h3: (Np, S, D) bf16; w_pad: (D, Cpad) bf16; b_pad: (1, Cpad) f32 -> (S, Cpad) f32."""
    Np, S, D = h3.shape
    Cpad = w_pad.shape[1]
    tn = _largest_divisor_at_most(
        Np, max(1, min(Np // 2 if Np > 1 else 1, 2048 // max(1, S))))
    return pl.pallas_call(
        functools.partial(_pool_classifier_kernel, inv_n=1.0 / Np),
        out_shape=jax.ShapeDtypeStruct((S, Cpad), jnp.float32),
        grid=(Np // tn,),
        in_specs=[pl.BlockSpec((tn, S, D), lambda i: (i, 0, 0)),
                  pl.BlockSpec((D, Cpad), lambda i: (0, 0)),
                  pl.BlockSpec((1, Cpad), lambda i: (0, 0))],
        out_specs=pl.BlockSpec((S, Cpad), lambda i: (0, 0)),
        scratch_shapes=[pltpu.VMEM((S, D), jnp.float32)],
        compiler_params=pltpu.CompilerParams(
            dimension_semantics=("arbitrary",), vmem_limit_bytes=_VMEM_LIMIT),
    )(h3, w_pad, b_pad)


# ----------------------------- parameters -----------------------------

def init_params(key, *, patch_size, num_channels, dim, num_layers,
                num_heads, mlp_dim, num_classes, num_patches):
    del num_heads
    keys = jax.random.split(key, 2 + num_layers)

    def dense(k, fan_in, fan_out):
        return jax.random.normal(k, (fan_in, fan_out), jnp.float32) * 0.02

    params = {
        "patch_w": dense(keys[0], num_channels * patch_size * patch_size, dim),
        "patch_b": jnp.zeros((dim,), jnp.float32),
        # Matches torch.zeros init of the positional embedding parameter.
        "pos": jnp.zeros((1, num_patches + 1, dim), jnp.float32),
        "cls_w": dense(keys[1], dim, num_classes),
        "cls_b": jnp.zeros((num_classes,), jnp.float32),
        "layers": [],
    }
    for i in range(num_layers):
        lk = jax.random.split(keys[2 + i], 4)
        params["layers"].append({
            "in_proj_w": dense(lk[0], dim, 3 * dim),
            "in_proj_b": jnp.zeros((3 * dim,), jnp.float32),
            "out_proj_w": dense(lk[1], dim, dim),
            "out_proj_b": jnp.zeros((dim,), jnp.float32),
            "ff1_w": dense(lk[2], dim, mlp_dim),
            "ff1_b": jnp.zeros((mlp_dim,), jnp.float32),
            "ff2_w": dense(lk[3], mlp_dim, dim),
            "ff2_b": jnp.zeros((dim,), jnp.float32),
            "ln1_g": jnp.ones((dim,), jnp.float32),
            "ln1_b": jnp.zeros((dim,), jnp.float32),
            "ln2_g": jnp.ones((dim,), jnp.float32),
            "ln2_b": jnp.zeros((dim,), jnp.float32),
        })
    return params


def prepare_params(params, *, seq_len, num_patches):
    """One-time (outside jit): bf16 matmul weights, (1, K) f32 biases, positional
    rows pre-expanded for the (patch-major, seq-minor) layout, lane-dense
    128-padded classifier."""
    def bf16(t):
        return t.astype(jnp.bfloat16)

    D = params["patch_w"].shape[1]
    num_classes = params["cls_w"].shape[1]
    cpad = ((num_classes + 127) // 128) * 128
    # TODO(synk): reference pos-embedding length is num_patches+1; first
    # num_patches rows are used (zeros under torch.zeros init).
    pos = params["pos"][0, :num_patches, :]
    prep = {
        "patch_w": bf16(params["patch_w"]),
        "patch_b": params["patch_b"].reshape(1, D),
        "pos_rep": jnp.repeat(pos, seq_len, axis=0),            # (Np*S, D) f32
        "cls_w_pad": bf16(jnp.zeros((D, cpad), jnp.float32)
                          .at[:, :num_classes].set(params["cls_w"])),
        "cls_b_pad": jnp.zeros((1, cpad), jnp.float32)
                     .at[:, :num_classes].set(params["cls_b"][None, :]),
        "layers": [],
    }
    for lp in params["layers"]:
        prep["layers"].append({
            "in_proj_w": bf16(lp["in_proj_w"]),
            "in_proj_b": lp["in_proj_b"].reshape(1, -1),
            "out_proj_w": bf16(lp["out_proj_w"]),
            "out_proj_b": lp["out_proj_b"].reshape(1, -1),
            "ff1_w": bf16(lp["ff1_w"]),
            "ff1_b": lp["ff1_b"].reshape(1, -1),
            "ff2_w": bf16(lp["ff2_w"]),
            "ff2_b": lp["ff2_b"].reshape(1, -1),
            "ln1_g": lp["ln1_g"].reshape(1, -1),
            "ln1_b": lp["ln1_b"].reshape(1, -1),
            "ln2_g": lp["ln2_g"].reshape(1, -1),
            "ln2_b": lp["ln2_b"].reshape(1, -1),
        })
    return prep


# ----------------------------- model wrapper -----------------------------

def vit_forward(prep, x, *, patch_size, num_heads, num_classes):
    B, C, H, W = x.shape
    P = patch_size
    Hn, Wn = H // P, W // P
    Np = Hn * Wn
    D = prep["patch_w"].shape[1]
    # nn.TransformerEncoder default batch_first=False: the (B, Np, D) tensor is
    # interpreted as (seq=B, batch=Np, embed=D).
    S = B
    scale = 1.0 / math.sqrt(D // num_heads)
    assert prep["pos_rep"].shape[0] == Np * S, "prepare_params seq_len mismatch"

    # --- patchify in bf16: Conv2d(kernel=stride=P) == unfold + matmul; rows are
    # ordered patch-major / seq-minor so every row tile holds whole seq groups ---
    xb = x.astype(jnp.bfloat16)
    patches = (xb.reshape(B, C, Hn, P, Wn, P)
                 .transpose(2, 4, 0, 1, 3, 5)            # (Hn, Wn, B, C, P, P)
                 .reshape(Np * S, C * P * P))

    tn = _pick_layer_tile(Np, S)
    rows = tn * S

    # Additive attention mask: tokens attend only inside their own patch group
    # (seq = S). Static numpy constant, identical for every row tile.
    group = np.arange(rows) // S
    attn_mask = jnp.asarray(
        np.where(group[:, None] == group[None, :], 0.0, -1e9).astype(np.float32))

    # patch embedding (+ fused positional add); dropout = identity.
    h = patch_embed(patches, prep["patch_w"], prep["patch_b"],
                    prep["pos_rep"], rows)               # (Np*S, D) bf16

    # TODO(synk): training-mode torch dropout (p=0.5) not reproduced (eval identity).
    for lp in prep["layers"]:
        h = encoder_layer(h, attn_mask, lp, num_heads=num_heads,
                          scale=scale, rows=rows)

    # mean over patches (torch dim=1) + classifier (lane-dense padded output).
    logits = pool_classifier(h.reshape(Np, S, D),
                             prep["cls_w_pad"], prep["cls_b_pad"])
    return logits[:, :num_classes]


if __name__ == "__main__":
    # Small synthetic config consistent with the module's forward.
    image_size = (16, 16)
    patch_size = 4
    num_channels = 4
    dim_embeddings = 32
    num_layers = 2
    num_heads = 4
    mlp_dim = 64
    num_classes = 10
    batch = 2

    num_patches = (image_size[0] // patch_size) * (image_size[1] // patch_size)

    key = jax.random.PRNGKey(0)
    pkey, xkey = jax.random.split(key)
    params = init_params(
        pkey, patch_size=patch_size, num_channels=num_channels,
        dim=dim_embeddings, num_layers=num_layers, num_heads=num_heads,
        mlp_dim=mlp_dim, num_classes=num_classes, num_patches=num_patches)
    # Weight prep (bf16 cast, padding, pos expansion) happens once, outside jit.
    prep = prepare_params(params, seq_len=batch, num_patches=num_patches)

    x = jax.random.normal(xkey, (batch, num_channels, *image_size), jnp.float32)

    fwd = jax.jit(functools.partial(vit_forward, patch_size=patch_size,
                                    num_heads=num_heads, num_classes=num_classes))
    out = fwd(prep, x)
    jax.block_until_ready(out)
    assert out.shape == (batch, num_classes), out.shape
    assert bool(jnp.all(jnp.isfinite(out))), "non-finite logits"
    print("KERNEL_OK")
</pallas_src>

<mosaic_0001>
module attributes {stable_mosaic.version = 11 : i64} {
  func.func @_patch_embed_kernel(%arg0: i32, %arg1: memref<16x64xbf16, #tpu.memory_space<vmem>>, %arg2: memref<64x32xbf16, #tpu.memory_space<vmem>>, %arg3: memref<1x32xf32, #tpu.memory_space<vmem>>, %arg4: memref<16x32xf32, #tpu.memory_space<vmem>>, %arg5: memref<16x32xbf16, #tpu.memory_space<vmem>>) attributes {dimension_semantics = [#tpu.dimension_semantics<parallel>], iteration_bounds = array<i64: 2>, scalar_prefetch = 0 : i64, scratch_operands = 0 : i64, tpu.core_type = #tpu.core_type<tc>, window_params = [{transform_indices = @transform_0, window_bounds = array<i64: 16, 64>}, {pipeline_mode = #tpu.pipeline_mode<synchronous>, transform_indices = @transform_1, window_bounds = array<i64: 64, 32>}, {pipeline_mode = #tpu.pipeline_mode<synchronous>, transform_indices = @transform_2, window_bounds = array<i64: 1, 32>}, {transform_indices = @transform_3, window_bounds = array<i64: 16, 32>}, {transform_indices = @transform_4, window_bounds = array<i64: 16, 32>}]} {
    %c0 = arith.constant 0 : index
    %c0_0 = arith.constant 0 : index
    %0 = vector.load %arg1[%c0, %c0_0] : memref<16x64xbf16, #tpu.memory_space<vmem>>, vector<16x64xbf16>
    %c0_1 = arith.constant 0 : index
    %c0_2 = arith.constant 0 : index
    %1 = vector.load %arg2[%c0_1, %c0_2] : memref<64x32xbf16, #tpu.memory_space<vmem>>, vector<64x32xbf16>
    %cst = arith.constant dense<0.000000e+00> : vector<16x32xf32>
    %2 = tpu.matmul %0, %1, %cst {dimension_numbers = #tpu.dot_dimension_numbers<[1], [0], [0], [1], [0, 0, 1, 1], [], []>} : vector<16x64xbf16>, vector<64x32xbf16>, vector<16x32xf32> -> vector<16x32xf32>
    %c0_3 = arith.constant 0 : index
    %c0_4 = arith.constant 0 : index
    %3 = vector.load %arg3[%c0_3, %c0_4] : memref<1x32xf32, #tpu.memory_space<vmem>>, vector<1x32xf32>
    %4 = vector.broadcast %3 : vector<1x32xf32> to vector<16x32xf32>
    %5 = arith.addf %2, %4 : vector<16x32xf32>
    %c0_5 = arith.constant 0 : index
    %c0_6 = arith.constant 0 : index
    %6 = vector.load %arg4[%c0_5, %c0_6] : memref<16x32xf32, #tpu.memory_space<vmem>>, vector<16x32xf32>
    %7 = arith.addf %5, %6 : vector<16x32xf32>
    %8 = arith.truncf %7 : vector<16x32xf32> to vector<16x32xbf16>
    %c0_7 = arith.constant 0 : index
    %c0_8 = arith.constant 0 : index
    %9 = vector.load %arg5[%c0_7, %c0_8] : memref<16x32xbf16, #tpu.memory_space<vmem>>, vector<16x32xbf16>
    tpu.vector_store %arg5[%c0_7, %c0_8], %8 {strides = array<i32>} : memref<16x32xbf16, #tpu.memory_space<vmem>>, vector<16x32xbf16>,
    return
  }
  func.func @transform_0(%arg0: i32) -> (i32, i32) {
    %c0_i32 = arith.constant 0 : i32
    %c0_i32_0 = arith.constant 0 : i32
    return %arg0, %c0_i32 : i32, i32
  }
  func.func @transform_1(%arg0: i32) -> (i32, i32) {
    %c0_i32 = arith.constant 0 : i32
    %c0_i32_0 = arith.constant 0 : i32
    %c0_i32_1 = arith.constant 0 : i32
    return %c0_i32, %c0_i32_0 : i32, i32
  }
  func.func @transform_2(%arg0: i32) -> (i32, i32) {
    %c0_i32 = arith.constant 0 : i32
    %c0_i32_0 = arith.constant 0 : i32
    %c0_i32_1 = arith.constant 0 : i32
    return %c0_i32, %c0_i32_0 : i32, i32
  }
  func.func @transform_3(%arg0: i32) -> (i32, i32) {
    %c0_i32 = arith.constant 0 : i32
    %c0_i32_0 = arith.constant 0 : i32
    return %arg0, %c0_i32 : i32, i32
  }
  func.func @transform_4(%arg0: i32) -> (i32, i32) {
    %c0_i32 = arith.constant 0 : i32
    %c0_i32_0 = arith.constant 0 : i32
    return %arg0, %c0_i32 : i32, i32
  }
}

module attributes {stable_mosaic.version = 11 : i64} {
  func.func @_encoder_layer_kernel(%arg0: i32, %arg1: memref<16x32xbf16, #tpu.memory_space<vmem>>, %arg2: memref<16x16xf32, #tpu.memory_space<vmem>>, %arg3: memref<32x96xbf16, #tpu.memory_space<vmem>>, %arg4: memref<1x96xf32, #tpu.memory_space<vmem>>, %arg5: memref<32x32xbf16, #tpu.memory_space<vmem>>, %arg6: memref<1x32xf32, #tpu.memory_space<vmem>>, %arg7: memref<1x32xf32, #tpu.memory_space<vmem>>, %arg8: memref<1x32xf32, #tpu.memory_space<vmem>>, %arg9: memref<32x64xbf16, #tpu.memory_space<vmem>>, %arg10: memref<1x64xf32, #tpu.memory_space<vmem>>, %arg11: memref<64x32xbf16, #tpu.memory_space<vmem>>, %arg12: memref<1x32xf32, #tpu.memory_space<vmem>>, %arg13: memref<1x32xf32, #tpu.memory_space<vmem>>, %arg14: memref<1x32xf32, #tpu.memory_space<vmem>>, %arg15: memref<16x32xbf16, #tpu.memory_space<vmem>>) attributes {dimension_semantics = [#tpu.dimension_semantics<parallel>], iteration_bounds = array<i64: 2>, scalar_prefetch = 0 : i64, scratch_operands = 0 : i64, tpu.core_type = #tpu.core_type<tc>, window_params = [{transform_indices = @transform_0, window_bounds = array<i64: 16, 32>}, {pipeline_mode = #tpu.pipeline_mode<synchronous>, transform_indices = @transform_1, window_bounds = array<i64: 16, 16>}, {pipeline_mode = #tpu.pipeline_mode<synchronous>, transform_indices = @transform_2, window_bounds = array<i64: 32, 96>}, {pipeline_mode = #tpu.pipeline_mode<synchronous>, transform_indices = @transform_3, window_bounds = array<i64: 1, 96>}, {pipeline_mode = #tpu.pipeline_mode<synchronous>, transform_indices = @transform_4, window_bounds = array<i64: 32, 32>}, {pipeline_mode = #tpu.pipeline_mode<synchronous>, transform_indices = @transform_5, window_bounds = array<i64: 1, 32>}, {pipeline_mode = #tpu.pipeline_mode<synchronous>, transform_indices = @transform_6, window_bounds = array<i64: 1, 32>}, {pipeline_mode = #tpu.pipeline_mode<synchronous>, transform_indices = @transform_7, window_bounds = array<i64: 1, 32>}, {pipeline_mode = #tpu.pipeline_mode<synchronous>, transform_indices = @transform_8, window_bounds = array<i64: 32, 64>}, {pipeline_mode = #tpu.pipeline_mode<synchronous>, transform_indices = @transform_9, window_bounds = array<i64: 1, 64>}, {pipeline_mode = #tpu.pipeline_mode<synchronous>, transform_indices = @transform_10, window_bounds = array<i64: 64, 32>}, {pipeline_mode = #tpu.pipeline_mode<synchronous>, transform_indices = @transform_11, window_bounds = array<i64: 1, 32>}, {pipeline_mode = #tpu.pipeline_mode<synchronous>, transform_indices = @transform_12, window_bounds = array<i64: 1, 32>}, {pipeline_mode = #tpu.pipeline_mode<synchronous>, transform_indices = @transform_13, window_bounds = array<i64: 1, 32>}, {transform_indices = @transform_14, window_bounds = array<i64: 16, 32>}]} {
    %c0 = arith.constant 0 : index
    %c0_0 = arith.constant 0 : index
    %0 = vector.load %arg1[%c0, %c0_0] : memref<16x32xbf16, #tpu.memory_space<vmem>>, vector<16x32xbf16>
    %1 = arith.extf %0 : vector<16x32xbf16> to vector<16x32xf32>
    %c0_1 = arith.constant 0 : index
    %c0_2 = arith.constant 0 : index
    %2 = vector.load %arg2[%c0_1, %c0_2] : memref<16x16xf32, #tpu.memory_space<vmem>>, vector<16x16xf32>
    %c0_3 = arith.constant 0 : index
    %c0_4 = arith.constant 0 : index
    %3 = vector.load %arg3[%c0_3, %c0_4] : memref<32x96xbf16, #tpu.memory_space<vmem>>, vector<32x96xbf16>
    %cst = arith.constant dense<0.000000e+00> : vector<16x96xf32>
    %4 = tpu.matmul %0, %3, %cst {dimension_numbers = #tpu.dot_dimension_numbers<[1], [0], [0], [1], [0, 0, 1, 1], [], []>} : vector<16x32xbf16>, vector<32x96xbf16>, vector<16x96xf32> -> vector<16x96xf32>
    %c0_5 = arith.constant 0 : index
    %c0_6 = arith.constant 0 : index
    %5 = vector.load %arg4[%c0_5, %c0_6] : memref<1x96xf32, #tpu.memory_space<vmem>>, vector<1x96xf32>
    %6 = vector.broadcast %5 : vector<1x96xf32> to vector<16x96xf32>
    %7 = arith.addf %4, %6 : vector<16x96xf32>
    %8 = vector.extract_strided_slice %7 {offsets = [0, 0], sizes = [16, 8], strides = [1, 1]} : vector<16x96xf32> to vector<16x8xf32>
    %9 = arith.truncf %8 : vector<16x8xf32> to vector<16x8xbf16>
    %10 = vector.extract_strided_slice %7 {offsets = [0, 32], sizes = [16, 8], strides = [1, 1]} : vector<16x96xf32> to vector<16x8xf32>
    %11 = arith.truncf %10 : vector<16x8xf32> to vector<16x8xbf16>
    %12 = vector.extract_strided_slice %7 {offsets = [0, 64], sizes = [16, 8], strides = [1, 1]} : vector<16x96xf32> to vector<16x8xf32>
    %13 = arith.truncf %12 : vector<16x8xf32> to vector<16x8xbf16>
    %cst_7 = arith.constant dense<0.000000e+00> : vector<16x16xf32>
    %14 = tpu.matmul %9, %11, %cst_7 {dimension_numbers = #tpu.dot_dimension_numbers<[1], [1], [0], [0], [0, 0, 1, 0], [], []>} : vector<16x8xbf16>, vector<16x8xbf16>, vector<16x16xf32> -> vector<16x16xf32>
    %cst_8 = arith.constant 0.353553385 : f32
    %15 = vector.broadcast %cst_8 : f32 to vector<16x16xf32>
    %16 = arith.mulf %14, %15 : vector<16x16xf32>
    %17 = arith.addf %16, %2 : vector<16x16xf32>
    %cst_9 = arith.constant dense<0xFF800000> : vector<16xf32>
    %18 = vector.multi_reduction <maximumf>, %17, %cst_9 [1] : vector<16x16xf32> to vector<16xf32>
    %19 = vector.shape_cast %18 : vector<16xf32> to vector<16x1xf32>
    %20 = vector.broadcast %19 : vector<16x1xf32> to vector<16x16xf32>
    %21 = arith.subf %17, %20 : vector<16x16xf32>
    %22 = math.exp %21 : vector<16x16xf32>
    %cst_10 = arith.constant dense<0.000000e+00> : vector<16xf32>
    %23 = vector.multi_reduction <add>, %22, %cst_10 [1] : vector<16x16xf32> to vector<16xf32>
    %24 = vector.shape_cast %23 : vector<16xf32> to vector<16x1xf32>
    %25 = tpu.reciprocal %24 {approx = true} : vector<16x1xf32> -> vector<16x1xf32>
    %26 = vector.broadcast %25 : vector<16x1xf32> to vector<16x16xf32>
    %27 = arith.mulf %22, %26 : vector<16x16xf32>
    %28 = arith.truncf %27 : vector<16x16xf32> to vector<16x16xbf16>
    %cst_11 = arith.constant dense<0.000000e+00> : vector<16x8xf32>
    %29 = tpu.matmul %28, %13, %cst_11 {dimension_numbers = #tpu.dot_dimension_numbers<[1], [0], [0], [1], [0, 0, 1, 1], [], []>} : vector<16x16xbf16>, vector<16x8xbf16>, vector<16x8xf32> -> vector<16x8xf32>
    %30 = vector.extract_strided_slice %7 {offsets = [0, 8], sizes = [16, 8], strides = [1, 1]} : vector<16x96xf32> to vector<16x8xf32>
    %31 = arith.truncf %30 : vector<16x8xf32> to vector<16x8xbf16>
    %32 = vector.extract_strided_slice %7 {offsets = [0, 40], sizes = [16, 8], strides = [1, 1]} : vector<16x96xf32> to vector<16x8xf32>
    %33 = arith.truncf %32 : vector<16x8xf32> to vector<16x8xbf16>
    %34 = vector.extract_strided_slice %7 {offsets = [0, 72], sizes = [16, 8], strides = [1, 1]} : vector<16x96xf32> to vector<16x8xf32>
    %35 = arith.truncf %34 : vector<16x8xf32> to vector<16x8xbf16>
    %cst_12 = arith.constant dense<0.000000e+00> : vector<16x16xf32>
    %36 = tpu.matmul %31, %33, %cst_12 {dimension_numbers = #tpu.dot_dimension_numbers<[1], [1], [0], [0], [0, 0, 1, 0], [], []>} : vector<16x8xbf16>, vector<16x8xbf16>, vector<16x16xf32> -> vector<16x16xf32>
    %cst_13 = arith.constant 0.353553385 : f32
    %37 = vector.broadcast %cst_13 : f32 to vector<16x16xf32>
    %38 = arith.mulf %36, %37 : vector<16x16xf32>
    %39 = arith.addf %38, %2 : vector<16x16xf32>
    %cst_14 = arith.constant dense<0xFF800000> : vector<16xf32>
    %40 = vector.multi_reduction <maximumf>, %39, %cst_14 [1] : vector<16x16xf32> to vector<16xf32>
    %41 = vector.shape_cast %40 : vector<16xf32> to vector<16x1xf32>
    %42 = vector.broadcast %41 : vector<16x1xf32> to vector<16x16xf32>
    %43 = arith.subf %39, %42 : vector<16x16xf32>
    %44 = math.exp %43 : vector<16x16xf32>
    %cst_15 = arith.constant dense<0.000000e+00> : vector<16xf32>
    %45 = vector.multi_reduction <add>, %44, %cst_15 [1] : vector<16x16xf32> to vector<16xf32>
    %46 = vector.shape_cast %45 : vector<16xf32> to vector<16x1xf32>
    %47 = tpu.reciprocal %46 {approx = true} : vector<16x1xf32> -> vector<16x1xf32>
    %48 = vector.broadcast %47 : vector<16x1xf32> to vector<16x16xf32>
    %49 = arith.mulf %44, %48 : vector<16x16xf32>
    %50 = arith.truncf %49 : vector<16x16xf32> to vector<16x16xbf16>
    %cst_16 = arith.constant dense<0.000000e+00> : vector<16x8xf32>
    %51 = tpu.matmul %50, %35, %cst_16 {dimension_numbers = #tpu.dot_dimension_numbers<[1], [0], [0], [1], [0, 0, 1, 1], [], []>} : vector<16x16xbf16>, vector<16x8xbf16>, vector<16x8xf32> -> vector<16x8xf32>
    %52 = vector.extract_strided_slice %7 {offsets = [0, 16], sizes = [16, 8], strides = [1, 1]} : vector<16x96xf32> to vector<16x8xf32>
    %53 = arith.truncf %52 : vector<16x8xf32> to vector<16x8xbf16>
    %54 = vector.extract_strided_slice %7 {offsets = [0, 48], sizes = [16, 8], strides = [1, 1]} : vector<16x96xf32> to vector<16x8xf32>
    %55 = arith.truncf %54 : vector<16x8xf32> to vector<16x8xbf16>
    %56 = vector.extract_strided_slice %7 {offsets = [0, 80], sizes = [16, 8], strides = [1, 1]} : vector<16x96xf32> to vector<16x8xf32>
    %57 = arith.truncf %56 : vector<16x8xf32> to vector<16x8xbf16>
    %cst_17 = arith.constant dense<0.000000e+00> : vector<16x16xf32>
    %58 = tpu.matmul %53, %55, %cst_17 {dimension_numbers = #tpu.dot_dimension_numbers<[1], [1], [0], [0], [0, 0, 1, 0], [], []>} : vector<16x8xbf16>, vector<16x8xbf16>, vector<16x16xf32> -> vector<16x16xf32>
    %cst_18 = arith.constant 0.353553385 : f32
    %59 = vector.broadcast %cst_18 : f32 to vector<16x16xf32>
    %60 = arith.mulf %58, %59 : vector<16x16xf32>
    %61 = arith.addf %60, %2 : vector<16x16xf32>
    %cst_19 = arith.constant dense<0xFF800000> : vector<16xf32>
    %62 = vector.multi_reduction <maximumf>, %61, %cst_19 [1] : vector<16x16xf32> to vector<16xf32>
    %63 = vector.shape_cast %62 : vector<16xf32> to vector<16x1xf32>
    %64 = vector.broadcast %63 : vector<16x1xf32> to vector<16x16xf32>
    %65 = arith.subf %61, %64 : vector<16x16xf32>
    %66 = math.exp %65 : vector<16x16xf32>
    %cst_20 = arith.constant dense<0.000000e+00> : vector<16xf32>
    %67 = vector.multi_reduction <add>, %66, %cst_20 [1] : vector<16x16xf32> to vector<16xf32>
    %68 = vector.shape_cast %67 : vector<16xf32> to vector<16x1xf32>
    %69 = tpu.reciprocal %68 {approx = true} : vector<16x1xf32> -> vector<16x1xf32>
    %70 = vector.broadcast %69 : vector<16x1xf32> to vector<16x16xf32>
    %71 = arith.mulf %66, %70 : vector<16x16xf32>
    %72 = arith.truncf %71 : vector<16x16xf32> to vector<16x16xbf16>
    %cst_21 = arith.constant dense<0.000000e+00> : vector<16x8xf32>
    %73 = tpu.matmul %72, %57, %cst_21 {dimension_numbers = #tpu.dot_dimension_numbers<[1], [0], [0], [1], [0, 0, 1, 1], [], []>} : vector<16x16xbf16>, vector<16x8xbf16>, vector<16x8xf32> -> vector<16x8xf32>
    %74 = vector.extract_strided_slice %7 {offsets = [0, 24], sizes = [16, 8], strides = [1, 1]} : vector<16x96xf32> to vector<16x8xf32>
    %75 = arith.truncf %74 : vector<16x8xf32> to vector<16x8xbf16>
    %76 = vector.extract_strided_slice %7 {offsets = [0, 56], sizes = [16, 8], strides = [1, 1]} : vector<16x96xf32> to vector<16x8xf32>
    %77 = arith.truncf %76 : vector<16x8xf32> to vector<16x8xbf16>
    %78 = vector.extract_strided_slice %7 {offsets = [0, 88], sizes = [16, 8], strides = [1, 1]} : vector<16x96xf32> to vector<16x8xf32>
    %79 = arith.truncf %78 : vector<16x8xf32> to vector<16x8xbf16>
    %cst_22 = arith.constant dense<0.000000e+00> : vector<16x16xf32>
    %80 = tpu.matmul %75, %77, %cst_22 {dimension_numbers = #tpu.dot_dimension_numbers<[1], [1], [0], [0], [0, 0, 1, 0], [], []>} : vector<16x8xbf16>, vector<16x8xbf16>, vector<16x16xf32> -> vector<16x16xf32>
    %cst_23 = arith.constant 0.353553385 : f32
    %81 = vector.broadcast %cst_23 : f32 to vector<16x16xf32>
    %82 = arith.mulf %80, %81 : vector<16x16xf32>
    %83 = arith.addf %82, %2 : vector<16x16xf32>
    %cst_24 = arith.constant dense<0xFF800000> : vector<16xf32>
    %84 = vector.multi_reduction <maximumf>, %83, %cst_24 [1] : vector<16x16xf32> to vector<16xf32>
    %85 = vector.shape_cast %84 : vector<16xf32> to vector<16x1xf32>
    %86 = vector.broadcast %85 : vector<16x1xf32> to vector<16x16xf32>
    %87 = arith.subf %83, %86 : vector<16x16xf32>
    %88 = math.exp %87 : vector<16x16xf32>
    %cst_25 = arith.constant dense<0.000000e+00> : vector<16xf32>
    %89 = vector.multi_reduction <add>, %88, %cst_25 [1] : vector<16x16xf32> to vector<16xf32>
    %90 = vector.shape_cast %89 : vector<16xf32> to vector<16x1xf32>
    %91 = tpu.reciprocal %90 {approx = true} : vector<16x1xf32> -> vector<16x1xf32>
    %92 = vector.broadcast %91 : vector<16x1xf32> to vector<16x16xf32>
    %93 = arith.mulf %88, %92 : vector<16x16xf32>
    %94 = arith.truncf %93 : vector<16x16xf32> to vector<16x16xbf16>
    %cst_26 = arith.constant dense<0.000000e+00> : vector<16x8xf32>
    %95 = tpu.matmul %94, %79, %cst_26 {dimension_numbers = #tpu.dot_dimension_numbers<[1], [0], [0], [1], [0, 0, 1, 1], [], []>} : vector<16x16xbf16>, vector<16x8xbf16>, vector<16x8xf32> -> vector<16x8xf32>
    %96 = tpu.concatenate %29, %51, %73, %95 in 1 : vector<16x8xf32>, vector<16x8xf32>, vector<16x8xf32>, vector<16x8xf32> -> vector<16x32xf32>
    %97 = arith.truncf %96 : vector<16x32xf32> to vector<16x32xbf16>
    %c0_27 = arith.constant 0 : index
    %c0_28 = arith.constant 0 : index
    %98 = vector.load %arg5[%c0_27, %c0_28] : memref<32x32xbf16, #tpu.memory_space<vmem>>, vector<32x32xbf16>
    %cst_29 = arith.constant dense<0.000000e+00> : vector<16x32xf32>
    %99 = tpu.matmul %97, %98, %cst_29 {dimension_numbers = #tpu.dot_dimension_numbers<[1], [0], [0], [1], [0, 0, 1, 1], [], []>} : vector<16x32xbf16>, vector<32x32xbf16>, vector<16x32xf32> -> vector<16x32xf32>
    %c0_30 = arith.constant 0 : index
    %c0_31 = arith.constant 0 : index
    %100 = vector.load %arg6[%c0_30, %c0_31] : memref<1x32xf32, #tpu.memory_space<vmem>>, vector<1x32xf32>
    %101 = vector.broadcast %100 : vector<1x32xf32> to vector<16x32xf32>
    %102 = arith.addf %99, %101 : vector<16x32xf32>
    %103 = arith.addf %102, %1 : vector<16x32xf32>
    %c0_32 = arith.constant 0 : index
    %c0_33 = arith.constant 0 : index
    %104 = vector.load %arg7[%c0_32, %c0_33] : memref<1x32xf32, #tpu.memory_space<vmem>>, vector<1x32xf32>
    %c0_34 = arith.constant 0 : index
    %c0_35 = arith.constant 0 : index
    %105 = vector.load %arg8[%c0_34, %c0_35] : memref<1x32xf32, #tpu.memory_space<vmem>>, vector<1x32xf32>
    %cst_36 = arith.constant dense<0.000000e+00> : vector<16xf32>
    %106 = vector.multi_reduction <add>, %103, %cst_36 [1] : vector<16x32xf32> to vector<16xf32>
    %107 = vector.shape_cast %106 : vector<16xf32> to vector<16x1xf32>
    %cst_37 = arith.constant 3.200000e+01 : f32
    %108 = vector.broadcast %cst_37 : f32 to vector<16x1xf32>
    %109 = arith.divf %107, %108 : vector<16x1xf32>
    %110 = arith.mulf %103, %103 : vector<16x32xf32>
    %cst_38 = arith.constant dense<0.000000e+00> : vector<16xf32>
    %111 = vector.multi_reduction <add>, %110, %cst_38 [1] : vector<16x32xf32> to vector<16xf32>
    %112 = vector.shape_cast %111 : vector<16xf32> to vector<16x1xf32>
    %cst_39 = arith.constant 3.200000e+01 : f32
    %113 = vector.broadcast %cst_39 : f32 to vector<16x1xf32>
    %114 = arith.divf %112, %113 : vector<16x1xf32>
    %115 = arith.mulf %109, %109 : vector<16x1xf32>
    %116 = arith.subf %114, %115 : vector<16x1xf32>
    %117 = vector.broadcast %109 : vector<16x1xf32> to vector<16x32xf32>
    %118 = arith.subf %103, %117 : vector<16x32xf32>
    %cst_40 = arith.constant 9.99999974E-6 : f32
    %119 = vector.broadcast %cst_40 : f32 to vector<16x1xf32>
    %120 = arith.addf %116, %119 : vector<16x1xf32>
    %121 = math.rsqrt %120 : vector<16x1xf32>
    %122 = vector.broadcast %121 : vector<16x1xf32> to vector<16x32xf32>
    %123 = arith.mulf %118, %122 : vector<16x32xf32>
    %124 = vector.broadcast %104 : vector<1x32xf32> to vector<16x32xf32>
    %125 = arith.mulf %123, %124 : vector<16x32xf32>
    %126 = vector.broadcast %105 : vector<1x32xf32> to vector<16x32xf32>
    %127 = arith.addf %125, %126 : vector<16x32xf32>
    %128 = arith.truncf %127 : vector<16x32xf32> to vector<16x32xbf16>
    %c0_41 = arith.constant 0 : index
    %c0_42 = arith.constant 0 : index
    %129 = vector.load %arg9[%c0_41, %c0_42] : memref<32x64xbf16, #tpu.memory_space<vmem>>, vector<32x64xbf16>
    %cst_43 = arith.constant dense<0.000000e+00> : vector<16x64xf32>
    %130 = tpu.matmul %128, %129, %cst_43 {dimension_numbers = #tpu.dot_dimension_numbers<[1], [0], [0], [1], [0, 0, 1, 1], [], []>} : vector<16x32xbf16>, vector<32x64xbf16>, vector<16x64xf32> -> vector<16x64xf32>
    %c0_44 = arith.constant 0 : index
    %c0_45 = arith.constant 0 : index
    %131 = vector.load %arg10[%c0_44, %c0_45] : memref<1x64xf32, #tpu.memory_space<vmem>>, vector<1x64xf32>
    %132 = vector.broadcast %131 : vector<1x64xf32> to vector<16x64xf32>
    %133 = arith.addf %130, %132 : vector<16x64xf32>
    %cst_46 = arith.constant 0.000000e+00 : f32
    %134 = vector.broadcast %cst_46 : f32 to vector<16x64xf32>
    %135 = arith.maximumf %133, %134 : vector<16x64xf32>
    %136 = arith.truncf %135 : vector<16x64xf32> to vector<16x64xbf16>
    %c0_47 = arith.constant 0 : index
    %c0_48 = arith.constant 0 : index
    %137 = vector.load %arg11[%c0_47, %c0_48] : memref<64x32xbf16, #tpu.memory_space<vmem>>, vector<64x32xbf16>
    %cst_49 = arith.constant dense<0.000000e+00> : vector<16x32xf32>
    %138 = tpu.matmul %136, %137, %cst_49 {dimension_numbers = #tpu.dot_dimension_numbers<[1], [0], [0], [1], [0, 0, 1, 1], [], []>} : vector<16x64xbf16>, vector<64x32xbf16>, vector<16x32xf32> -> vector<16x32xf32>
    %c0_50 = arith.constant 0 : index
    %c0_51 = arith.constant 0 : index
    %139 = vector.load %arg12[%c0_50, %c0_51] : memref<1x32xf32, #tpu.memory_space<vmem>>, vector<1x32xf32>
    %140 = vector.broadcast %139 : vector<1x32xf32> to vector<16x32xf32>
    %141 = arith.addf %138, %140 : vector<16x32xf32>
    %142 = arith.addf %141, %127 : vector<16x32xf32>
    %c0_52 = arith.constant 0 : index
    %c0_53 = arith.constant 0 : index
    %143 = vector.load %arg13[%c0_52, %c0_53] : memref<1x32xf32, #tpu.memory_space<vmem>>, vector<1x32xf32>
    %c0_54 = arith.constant 0 : index
    %c0_55 = arith.constant 0 : index
    %144 = vector.load %arg14[%c0_54, %c0_55] : memref<1x32xf32, #tpu.memory_space<vmem>>, vector<1x32xf32>
    %cst_56 = arith.constant dense<0.000000e+00> : vector<16xf32>
    %145 = vector.multi_reduction <add>, %142, %cst_56 [1] : vector<16x32xf32> to vector<16xf32>
    %146 = vector.shape_cast %145 : vector<16xf32> to vector<16x1xf32>
    %cst_57 = arith.constant 3.200000e+01 : f32
    %147 = vector.broadcast %cst_57 : f32 to vector<16x1xf32>
    %148 = arith.divf %146, %147 : vector<16x1xf32>
    %149 = arith.mulf %142, %142 : vector<16x32xf32>
    %cst_58 = arith.constant dense<0.000000e+00> : vector<16xf32>
    %150 = vector.multi_reduction <add>, %149, %cst_58 [1] : vector<16x32xf32> to vector<16xf32>
    %151 = vector.shape_cast %150 : vector<16xf32> to vector<16x1xf32>
    %cst_59 = arith.constant 3.200000e+01 : f32
    %152 = vector.broadcast %cst_59 : f32 to vector<16x1xf32>
    %153 = arith.divf %151, %152 : vector<16x1xf32>
    %154 = arith.mulf %148, %148 : vector<16x1xf32>
    %155 = arith.subf %153, %154 : vector<16x1xf32>
    %156 = vector.broadcast %148 : vector<16x1xf32> to vector<16x32xf32>
    %157 = arith.subf %142, %156 : vector<16x32xf32>
    %cst_60 = arith.constant 9.99999974E-6 : f32
    %158 = vector.broadcast %cst_60 : f32 to vector<16x1xf32>
    %159 = arith.addf %155, %158 : vector<16x1xf32>
    %160 = math.rsqrt %159 : vector<16x1xf32>
    %161 = vector.broadcast %160 : vector<16x1xf32> to vector<16x32xf32>
    %162 = arith.mulf %157, %161 : vector<16x32xf32>
    %163 = vector.broadcast %143 : vector<1x32xf32> to vector<16x32xf32>
    %164 = arith.mulf %162, %163 : vector<16x32xf32>
    %165 = vector.broadcast %144 : vector<1x32xf32> to vector<16x32xf32>
    %166 = arith.addf %164, %165 : vector<16x32xf32>
    %167 = arith.truncf %166 : vector<16x32xf32> to vector<16x32xbf16>
    %c0_61 = arith.constant 0 : index
    %c0_62 = arith.constant 0 : index
    %168 = vector.load %arg15[%c0_61, %c0_62] : memref<16x32xbf16, #tpu.memory_space<vmem>>, vector<16x32xbf16>
    tpu.vector_store %arg15[%c0_61, %c0_62], %167 {strides = array<i32>} : memref<16x32xbf16, #tpu.memory_space<vmem>>, vector<16x32xbf16>,
    return
  }
  func.func @transform_0(%arg0: i32) -> (i32, i32) {
    %c0_i32 = arith.constant 0 : i32
    %c0_i32_0 = arith.constant 0 : i32
    return %arg0, %c0_i32 : i32, i32
  }
  func.func @transform_1(%arg0: i32) -> (i32, i32) {
    %c0_i32 = arith.constant 0 : i32
    %c0_i32_0 = arith.constant 0 : i32
    %c0_i32_1 = arith.constant 0 : i32
    return %c0_i32, %c0_i32_0 : i32, i32
  }
  func.func @transform_2(%arg0: i32) -> (i32, i32) {
    %c0_i32 = arith.constant 0 : i32
    %c0_i32_0 = arith.constant 0 : i32
    %c0_i32_1 = arith.constant 0 : i32
    return %c0_i32, %c0_i32_0 : i32, i32
  }
  func.func @transform_3(%arg0: i32) -> (i32, i32) {
    %c0_i32 = arith.constant 0 : i32
    %c0_i32_0 = arith.constant 0 : i32
    %c0_i32_1 = arith.constant 0 : i32
    return %c0_i32, %c0_i32_0 : i32, i32
  }
  func.func @transform_4(%arg0: i32) -> (i32, i32) {
    %c0_i32 = arith.constant 0 : i32
    %c0_i32_0 = arith.constant 0 : i32
    %c0_i32_1 = arith.constant 0 : i32
    return %c0_i32, %c0_i32_0 : i32, i32
  }
  func.func @transform_5(%arg0: i32) -> (i32, i32) {
    %c0_i32 = arith.constant 0 : i32
    %c0_i32_0 = arith.constant 0 : i32
    %c0_i32_1 = arith.constant 0 : i32
    return %c0_i32, %c0_i32_0 : i32, i32
  }
  func.func @transform_6(%arg0: i32) -> (i32, i32) {
    %c0_i32 = arith.constant 0 : i32
    %c0_i32_0 = arith.constant 0 : i32
    %c0_i32_1 = arith.constant 0 : i32
    return %c0_i32, %c0_i32_0 : i32, i32
  }
  func.func @transform_7(%arg0: i32) -> (i32, i32) {
    %c0_i32 = arith.constant 0 : i32
    %c0_i32_0 = arith.constant 0 : i32
    %c0_i32_1 = arith.constant 0 : i32
    return %c0_i32, %c0_i32_0 : i32, i32
  }
  func.func @transform_8(%arg0: i32) -> (i32, i32) {
    %c0_i32 = arith.constant 0 : i32
    %c0_i32_0 = arith.constant 0 : i32
    %c0_i32_1 = arith.constant 0 : i32
    return %c0_i32, %c0_i32_0 : i32, i32
  }
  func.func @transform_9(%arg0: i32) -> (i32, i32) {
    %c0_i32 = arith.constant 0 : i32
    %c0_i32_0 = arith.constant 0 : i32
    %c0_i32_1 = arith.constant 0 : i32
    return %c0_i32, %c0_i32_0 : i32, i32
  }
  func.func @transform_10(%arg0: i32) -> (i32, i32) {
    %c0_i32 = arith.constant 0 : i32
    %c0_i32_0 = arith.constant 0 : i32
    %c0_i32_1 = arith.constant 0 : i32
    return %c0_i32, %c0_i32_0 : i32, i32
  }
  func.func @transform_11(%arg0: i32) -> (i32, i32) {
    %c0_i32 = arith.constant 0 : i32
    %c0_i32_0 = arith.constant 0 : i32
    %c0_i32_1 = arith.constant 0 : i32
    return %c0_i32, %c0_i32_0 : i32, i32
  }
  func.func @transform_12(%arg0: i32) -> (i32, i32) {
    %c0_i32 = arith.constant 0 : i32
    %c0_i32_0 = arith.constant 0 : i32
    %c0_i32_1 = arith.constant 0 : i32
    return %c0_i32, %c0_i32_0 : i32, i32
  }
  func.func @transform_13(%arg0: i32) -> (i32, i32) {
    %c0_i32 = arith.constant 0 : i32
    %c0_i32_0 = arith.constant 0 : i32
    %c0_i32_1 = arith.constant 0 : i32
    return %c0_i32, %c0_i32_0 : i32, i32
  }
  func.func @transform_14(%arg0: i32) -> (i32, i32) {
    %c0_i32 = arith.constant 0 : i32
    %c0_i32_0 = arith.constant 0 : i32
    return %arg0, %c0_i32 : i32, i32
  }
}

module attributes {stable_mosaic.version = 11 : i64} {
  func.func @_pool_classifier_kernel(%arg0: i32, %arg1: memref<8x2x32xbf16, #tpu.memory_space<vmem>>, %arg2: memref<32x128xbf16, #tpu.memory_space<vmem>>, %arg3: memref<1x128xf32, #tpu.memory_space<vmem>>, %arg4: memref<2x128xf32, #tpu.memory_space<vmem>>, %arg5: memref<2x32xf32, #tpu.memory_space<vmem>>) attributes {dimension_semantics = [#tpu.dimension_semantics<arbitrary>], iteration_bounds = array<i64: 2>, scalar_prefetch = 0 : i64, scratch_operands = 1 : i64, tpu.core_type = #tpu.core_type<tc>, window_params = [{transform_indices = @transform_0, window_bounds = array<i64: 8, 2, 32>}, {pipeline_mode = #tpu.pipeline_mode<synchronous>, transform_indices = @transform_1, window_bounds = array<i64: 32, 128>}, {pipeline_mode = #tpu.pipeline_mode<synchronous>, transform_indices = @transform_2, window_bounds = array<i64: 1, 128>}, {pipeline_mode = #tpu.pipeline_mode<synchronous>, transform_indices = @transform_3, window_bounds = array<i64: 2, 128>}]} {
    %c0_i32 = arith.constant 0 : i32
    %0 = arith.cmpi eq, %arg0, %c0_i32 : i32
    %1 = arith.extui %0 : i1 to i32
    %c0_i32_0 = arith.constant 0 : i32
    %2 = arith.cmpi ne, %1, %c0_i32_0 : i32
    scf.if %2 {
      %cst_8 = arith.constant 0.000000e+00 : f32
      %12 = vector.broadcast %cst_8 : f32 to vector<2x32xf32>
      %c0_9 = arith.constant 0 : index
      %c0_10 = arith.constant 0 : index
      %13 = vector.load %arg5[%c0_9, %c0_10] : memref<2x32xf32, #tpu.memory_space<vmem>>, vector<2x32xf32>
      tpu.vector_store %arg5[%c0_9, %c0_10], %12 {strides = array<i32>} : memref<2x32xf32, #tpu.memory_space<vmem>>, vector<2x32xf32>,
    } else {
    }
    %c0 = arith.constant 0 : index
    %c0_1 = arith.constant 0 : index
    %3 = vector.load %arg5[%c0, %c0_1] : memref<2x32xf32, #tpu.memory_space<vmem>>, vector<2x32xf32>
    %c0_2 = arith.constant 0 : index
    %c0_3 = arith.constant 0 : index
    %c0_4 = arith.constant 0 : index
    %4 = vector.load %arg1[%c0_2, %c0_3, %c0_4] : memref<8x2x32xbf16, #tpu.memory_space<vmem>>, vector<8x2x32xbf16>
    %5 = arith.extf %4 : vector<8x2x32xbf16> to vector<8x2x32xf32>
    %cst = arith.constant dense<0.000000e+00> : vector<2x32xf32>
    %6 = vector.multi_reduction <add>, %5, %cst [0] : vector<8x2x32xf32> to vector<2x32xf32>
    %7 = arith.addf %3, %6 : vector<2x32xf32>
    %c0_5 = arith.constant 0 : index
    %c0_6 = arith.constant 0 : index
    %8 = vector.load %arg5[%c0_5, %c0_6] : memref<2x32xf32, #tpu.memory_space<vmem>>, vector<2x32xf32>
    tpu.vector_store %arg5[%c0_5, %c0_6], %7 {strides = array<i32>} : memref<2x32xf32, #tpu.memory_space<vmem>>, vector<2x32xf32>,
    %c1_i32 = arith.constant 1 : i32
    %9 = arith.cmpi eq, %arg0, %c1_i32 : i32
    %10 = arith.extui %9 : i1 to i32
    %c0_i32_7 = arith.constant 0 : i32
    %11 = arith.cmpi ne, %10, %c0_i32_7 : i32
    scf.if %11 {
      %c0_8 = arith.constant 0 : index
      %c0_9 = arith.constant 0 : index
      %12 = vector.load %arg5[%c0_8, %c0_9] : memref<2x32xf32, #tpu.memory_space<vmem>>, vector<2x32xf32>
      %cst_10 = arith.constant 6.250000e-02 : f32
      %13 = vector.broadcast %cst_10 : f32 to vector<2x32xf32>
      %14 = arith.mulf %12, %13 : vector<2x32xf32>
      %15 = arith.truncf %14 : vector<2x32xf32> to vector<2x32xbf16>
      %c0_11 = arith.constant 0 : index
      %c0_12 = arith.constant 0 : index
      %16 = vector.load %arg2[%c0_11, %c0_12] : memref<32x128xbf16, #tpu.memory_space<vmem>>, vector<32x128xbf16>
      %cst_13 = arith.constant dense<0.000000e+00> : vector<2x128xf32>
      %17 = tpu.matmul %15, %16, %cst_13 {dimension_numbers = #tpu.dot_dimension_numbers<[1], [0], [0], [1], [0, 0, 1, 1], [], []>} : vector<2x32xbf16>, vector<32x128xbf16>, vector<2x128xf32> -> vector<2x128xf32>
      %c0_14 = arith.constant 0 : index
      %c0_15 = arith.constant 0 : index
      %18 = vector.load %arg3[%c0_14, %c0_15] : memref<1x128xf32, #tpu.memory_space<vmem>>, vector<1x128xf32>
      %19 = vector.broadcast %18 : vector<1x128xf32> to vector<2x128xf32>
      %20 = arith.addf %17, %19 : vector<2x128xf32>
      %c0_16 = arith.constant 0 : index
      %c0_17 = arith.constant 0 : index
      %21 = vector.load %arg4[%c0_16, %c0_17] : memref<2x128xf32, #tpu.memory_space<vmem>>, vector<2x128xf32>
      tpu.vector_store %arg4[%c0_16, %c0_17], %20 {strides = array<i32>} : memref<2x128xf32, #tpu.memory_space<vmem>>, vector<2x128xf32>,
    } else {
    }
    return
  }
  func.func @transform_0(%arg0: i32) -> (i32, i32, i32) {
    %c0_i32 = arith.constant 0 : i32
    %c0_i32_0 = arith.constant 0 : i32
    %c0_i32_1 = arith.constant 0 : i32
    return %arg0, %c0_i32, %c0_i32_0 : i32, i32, i32
  }
  func.func @transform_1(%arg0: i32) -> (i32, i32) {
    %c0_i32 = arith.constant 0 : i32
    %c0_i32_0 = arith.constant 0 : i32
    %c0_i32_1 = arith.constant 0 : i32
    return %c0_i32, %c0_i32_0 : i32, i32
  }
  func.func @transform_2(%arg0: i32) -> (i32, i32) {
    %c0_i32 = arith.constant 0 : i32
    %c0_i32_0 = arith.constant 0 : i32
    %c0_i32_1 = arith.constant 0 : i32
    return %c0_i32, %c0_i32_0 : i32, i32
  }
  func.func @transform_3(%arg0: i32) -> (i32, i32) {
    %c0_i32 = arith.constant 0 : i32
    %c0_i32_0 = arith.constant 0 : i32
    %c0_i32_1 = arith.constant 0 : i32
    return %c0_i32, %c0_i32_0 : i32, i32
  }
}

</mosaic_0001>

<bundles_post_ra>
// kernel: vit_forward.4
= control target key start
LH: loop header
LB: loop body
LE: loop exit
PB: predicated region body
PF: predicated region fallthrough
CT: control target
= control target key end

     0   :  { %s489_s15 = smov 0   ;;  %s524_s0 = inlined_call_operand.vmem [shape: bf16[32,64], index: 0, kind: input, shape index: {}]   ;;  %s525_s1 = inlined_call_operand.vmem [shape: bf16[64,32], index: 1, kind: input, shape index: {}]   ;;  %s526_s2 = inlined_call_operand.vmem [shape: f32[1,32], index: 2, kind: input, shape index: {}]   ;;  %s527_s3 = inlined_call_operand.vmem [shape: f32[32,32], index: 3, kind: input, shape index: {}]   ;;  %s528_s4 = inlined_call_operand.vmem [shape: bf16[32,32], index: 4, kind: output, shape index: {}]  }
   0x1 LB: > { %s398_s16 = sadd.s32 4294967295, %s460_s15   ;;  %p402_p0 = scmp.ge.s32.totalorder %s460_s15, 1  ;;  %s460_s15 = sphi %s489_s15, %s14_s15  }
   0x2   : > { %p174_p1 = scmp.lt.s32.totalorder %s460_s15, 3 }
   0x4   : > { %p175_p2 = pnand %p402_p0, %p174_p1 }
   0x5   : > { %s403_s21 = sshll.u32 (!%p175_p2), %s398_s16, 1 }
   0x6   : > { %178 = sbr.rel (%p175_p2) target bundleno = 232 (0xe8), region = 36  ;;  %p206_p3 = scmp.lt.s32.totalorder (!%p175_p2), %s403_s21, 3 }
   0xb   : > { %v449_v0 = vld [vmem:[%s525_s1 + $0x18] sm:$0xff]   ;;  %v462_v1 = vmov 0.0   ;;  %v450_v2 = vld [vmem:[%s525_s1 + $0x10] sm:$0xff]   ;;  %vm463_vm0 = vmmov 0   ;;  %s530_s21 = smov (!%p206_p3, %s403_s21), 3  ;;  %v451_v3 = vld [vmem:[%s525_s1 + $0x8] sm:$0xff]  }
   0xc   : > { %427 = vmatprep.subr.bf16.mxu0 %v462_v1  ;;  %435 = vmatprep.mubr.msk.bf16.mxu0 %vm463_vm0, %v462_v1  ;;  %s404_s24 = sshll.u32 %s530_s21, 2  ;;  %v452_v4 = vld [vmem:[%s525_s1] sm:$0xff]   ;;  %vm270_vm1 = vcmask 523264   ;;  %s406_s30 = sshll.u32 %s530_s21, 3  ;;  %vm327_vm2 = vcmask 257024  }
   0xd   : > { %428 = vmatpush3.bf16.msra.mxu0 %v449_v0  ;;  %s209_s27 = scalar_lea.vmem %s524_s0, %s404_s24  ;;  %s215_s7 = scalar_lea.vmem %s527_s3, %s406_s30  ;;  %v409_v6 = vld [vmem:[%s526_s2] ss:$0 sm:$0xff] }
   0xe   : > { %429 = vmatprep.subr.bf16.mxu0 %v462_v1  ;;  %v453_v5 = vld [vmem:[%s209_s27] sm:$0xff]   ;;  %s221_s12 = scalar_lea.vmem %s528_s4, %s404_s24  ;;  %v316_v13 = vld [vmem:[%s215_s7 + $0x8] sm:$0xff] }
   0xf   : > { %v315_v8 = vld [vmem:[%s215_s7] sm:$0xff] }
  0x11   : > { %430 = vmatpush3.bf16.msra.mxu0 %v450_v2 }
  0x12   : > { %431 = vmatprep.subr.bf16.mxu0 %v462_v1 }
  0x15   : > { %432 = vmatpush3.bf16.msra.mxu0 %v451_v3 }
  0x16   : > { %433 = vmatprep.subr.bf16.mxu0 %v462_v1 }
  0x19   : > { %434 = vmatpush3.bf16.msra.mxu0 %v452_v4 }
  0x1c   : > { %436 = vmatmul.mubr.msk.bf16.vlgmr.msra.gmra.mxu0 %vm270_vm1, %v453_v5 }
  0xdc   : > { %v308_v7 = vpop.f32.mrf.mxu0 }
  0xdd   : > { %v309_v9 = vadd.f32 %v409_v6, %v308_v7 }
  0xde   : > { %v437_v10 = vpop.f32.mrf.mxu0 }
  0xdf   : > { %v317_v11 = vadd.f32 %v315_v8, %v309_v9 }
  0xe0   : > { %v311_v12 = vpop.f32.mrf.mxu0 }
  0xe1   : > { %v420_v14 = vpack.c.bf16 %v317_v11, %v317_v11  ;;  %v312_v15 = vadd.f32 %v409_v6, %v311_v12 }
  0xe2   : > { %v438_v16 = vpop.f32.mrf.mxu0 }
  0xe3   : > { %328 = vst.msk [vmem:[%s221_s12] sm:$0xf] %vm327_vm2, %v420_v14  ;;  %v318_v17 = vadd.f32 %v316_v13, %v312_v15 }
  0xe5   : > { %v421_v18 = vpack.c.bf16 %v318_v17, %v318_v17 }
  0xe7   : > { %329 = vst.msk [vmem:[%s221_s12 + $0x4] sm:$0xf] %vm327_vm2, %v421_v18 }
  0xe8 PF: > { %s14_s15 = sadd.s32 1, %s460_s15  }
  0xe9   : > { %p11_p4 = scmp.ge.s32.totalorder %s14_s15, 4  }
  0xeb   :  { %13 = sbr.rel (!%p11_p4) target bundleno = 1 (0x1), region = 69 }

// kernel: vit_forward.7
= control target key start
LH: loop header
LB: loop body
LE: loop exit
PB: predicated region body
PF: predicated region fallthrough
CT: control target
= control target key end

     0   :  { %8 = vsyncpa [#allocation4], 0  ;;  %s422_s12 = smov 0   ;;  %s471_s0 = inlined_call_operand.vmem [shape: bf16[16,2,32], index: 0, kind: input, shape index: {}]   ;;  %s472_s1 = inlined_call_operand.vmem [shape: bf16[32,128], index: 1, kind: input, shape index: {}]   ;;  %s473_s2 = inlined_call_operand.vmem [shape: f32[1,128], index: 2, kind: input, shape index: {}]   ;;  %s474_s3 = inlined_call_operand.hbm [shape: f32[2,128], index: 3, kind: output, shape index: {}]  }
   0x1 LB: > { %s428_s13 = sadd.s32 4294967295, %s396_s12   ;;  %p319_p0 = scmp.ge.s32.totalorder %s396_s12, 1  ;;  %s396_s12 = sphi %s422_s12, %s14_s12  }
   0x2   : > { %p133_p1 = scmp.lt.s32.totalorder %s396_s12, 3 }
   0x4   : > { %p134_p2 = pnand %p319_p0, %p133_p1 }
   0x5   : > { %s320_s14 = sshll.u32 (!%p134_p2), %s428_s13, 3  ;;  %p321_p4 = scmp.ne.s32.totalorder (!%p134_p2), %s428_s13, 0 }
   0x6   : > { %137 = sbr.rel (%p134_p2) target bundleno = 264 (0x108), region = 32  ;;  %p152_p3 = scmp.lt.s32.totalorder (!%p134_p2), %s320_s14, 15 }
   0xb   : > { %s476_s14 = smov (!%p152_p3, %s320_s14), 15  ;;  %160 = sbr.rel (%p321_p4) target bundleno = 18 (0x12), region = 36 }
   0xc   : > { %s154_s17 = scalar_lea.vmem %s471_s0, %s476_s14 }
  0x10   : > { %vm161_vm0 = vcmask 254976   ;;  %v398_v0 = vmov 0.0  }
  0x11   : > { %162 = vst.msk [vmem:[#allocation2] sm:$0x3] %vm161_vm0, %v398_v0 }
  0x12 PF: > { %v164_v1 = vld [vmem:[%s154_s17] sm:$0x1]  ;;  %v165_v2 = vld [vmem:[%s154_s17 + $0x1] sm:$0x1]  ;;  %v166_v3 = vld [vmem:[%s154_s17 + $0x2] sm:$0x1] }
  0x13   : > { %v167_v4 = vld [vmem:[%s154_s17 + $0x3] sm:$0x1]  ;;  %v168_v5 = vld [vmem:[%s154_s17 + $0x4] sm:$0x1]  ;;  %v172_v6 = vunpack.c.l.bf16 %v164_v1  ;;  %v173_v7 = vunpack.c.l.bf16 %v165_v2  ;;  %v174_v8 = vunpack.c.l.bf16 %v166_v3  ;;  %v169_v10 = vld [vmem:[%s154_s17 + $0x5] sm:$0x1] }
  0x14   : > { %v175_v9 = vunpack.c.l.bf16 %v167_v4  ;;  %vm180_vm1 = vcmask 254976   ;;  %v176_v11 = vunpack.c.l.bf16 %v168_v5  ;;  %v170_v15 = vld [vmem:[%s154_s17 + $0x6] sm:$0x1]  ;;  %v177_v17 = vunpack.c.l.bf16 %v169_v10  ;;  %v171_v19 = vld [vmem:[%s154_s17 + $0x7] sm:$0x1]  ;;  %p322_p5 = scmp.ne.s32.totalorder %s428_s13, 1 }
  0x15   : > { %v181_v12 = vsel %vm180_vm1, %v172_v6, 0.0  ;;  %v182_v13 = vsel %vm180_vm1, %v173_v7, 0.0  ;;  %v184_v14 = vsel %vm180_vm1, %v174_v8, 0.0  ;;  %v178_v21 = vunpack.c.l.bf16 %v170_v15 }
  0x16   : > { %v183_v16 = vadd.f32 %v182_v13, %v181_v12  ;;  %v186_v18 = vsel %vm180_vm1, %v175_v9, 0.0  ;;  %v188_v22 = vsel %vm180_vm1, %v176_v11, 0.0  ;;  %v179_v24 = vunpack.c.l.bf16 %v171_v19 }
  0x17   : > { %v190_v25 = vsel %vm180_vm1, %v177_v17, 0.0  ;;  %v192_v27 = vsel %vm180_vm1, %v178_v21, 0.0 }
  0x18   : > { %v185_v20 = vadd.f32 %v184_v14, %v183_v16  ;;  %v194_v29 = vsel %vm180_vm1, %v179_v24, 0.0  ;;  %v163_v31 = vld [vmem:[#allocation2] sm:$0x3] }
  0x1a   : > { %v187_v23 = vadd.f32 %v186_v18, %v185_v20 }
  0x1c   : > { %v189_v26 = vadd.f32 %v188_v22, %v187_v23 }
  0x1e   : > { %v191_v28 = vadd.f32 %v190_v25, %v189_v26 }
  0x20   : > { %v193_v30 = vadd.f32 %v192_v27, %v191_v28 }
  0x22   : > { %v195_v32 = vadd.f32 %v194_v29, %v193_v30  ;;  %201 = sbr.rel (%p322_p5) target bundleno = 249 (0xf9), region = 40 }
  0x24   : > { %v196_v33 = vadd.f32 %v195_v32, %v163_v31 }
  0x26   : > { %197 = vst.msk [vmem:[#allocation2] sm:$0x3] %vm180_vm1, %v196_v33 }
  0x27   : > { %v360_v34 = vld [vmem:[%s472_s1 + $0x8] sm:$0xff]   ;;  %v399_v35 = vmov 0.0   ;;  %v361_v36 = vld [vmem:[%s472_s1] sm:$0xff]   ;;  %vm400_vm2 = vmmov 0   ;;  %vm228_vm3 = vcmask 261120  }
  0x28   : > { %334 = vmatprep.subr.bf16.mxu0 %v399_v35  ;;  %338 = vmatprep.mubr.msk.bf16.mxu0 %vm400_vm2, %v399_v35  ;;  %v323_v40 = vld [vmem:[%s473_s2] ss:$0 sm:$0xff] }
  0x29   : > { %335 = vmatpush3.bf16.msra.mxu0 %v360_v34 }
  0x2a   : > { %336 = vmatprep.subr.bf16.mxu0 %v399_v35 }
  0x2d   : > { %v202_v37 = vld [vmem:[#allocation2] sm:$0x3]  ;;  %337 = vmatpush3.bf16.msra.mxu0 %v361_v36 }
  0x2e   : > { %v203_v38 = vmul.f32 0.0625, %v202_v37 }
  0x30   : > { %v204_v39 = vpack.c.bf16 %v203_v38, %v203_v38 }
  0x32   : > { %339 = vmatmul.mubr.msk.bf16.vlgmr.msra.gmra.mxu0 %vm228_vm3, %v204_v39 }
  0xf2   : > { %v266_v41 = vpop.f32.mrf.mxu0 }
  0xf3   : > { %v267_v42 = vadd.f32 %v323_v40, %v266_v41 }
  0xf4   : > { %v340_v43 = vpop.f32.mrf.mxu0 }
  0xf5   : > { %272 = vst [vmem:[#allocation3] sm:$0x3] %v267_v42 }
  0xf6   : > { %v269_v44 = vpop.f32.mrf.mxu0 }
  0xf8   : > { %v341_v45 = vpop.f32.mrf.mxu0 }
  0xf9 PF: > { %p346_p6 = scmp.eq.s32.totalorder %s428_s13, 1  ;;  %s401_s24 = smov [#allocation3]  }
  0xfa   : > { %s280_s25 = sshll.u32 %s401_s24, 4  ;;  %s281_s25 = int_to_ptr.vmem [resolvable:$true] %s280_s25 }
  0xfb   : > { %s362_s26 = scalar_lea.vmem %s281_s25, 32  ;;  %p369_p10 = scmp.lt.s32.totalorder %s281_s25, %s281_s25 }
  0xfc   : > { %p363_p7 = scmp.ne.s32.totalorder %s281_s25, %s362_s26  ;;  %p370_p11 = scmp.lt.s32.totalorder %s362_s26, %s362_s26 }
  0xfe   : > { %p364_p8 = pnand %p363_p7, %p346_p6  ;;  %p371_p12 = por %p370_p11, %p369_p10 }
 0x100   : > { %p365_p9 = pneg %p364_p8 }
 0x102   : > { %p372_p13 = pnand %p371_p12, %p365_p9 }
 0x104   : > { %375 = shalt.err (!%p372_p13)
}
 0x105   : > { %343 = dma.vmem_to_hbm [thread:$0]  (%p346_p6), %s281_s25, 32, %s474_s3, [#allocation4]  }
 0x106   : > { %391 = dma.done.wait (%p346_p6), [#allocation4], 32  }
 0x107   : > { %393 = vsyncadd (%p346_p6), [#allocation4], 4294967264 }
 0x108 PF: > { %s14_s12 = sadd.s32 1, %s396_s12  }
 0x109   : > { %p11_p0 = scmp.ge.s32.totalorder %s14_s12, 4  }
 0x10b   :  { %13 = sbr.rel (!%p11_p0) target bundleno = 1 (0x1), region = 67 }
 0x110   :  { %293 = vsyncpa [#allocation4], 1 }
 0x111   :  { %295 = vsyncpa [#allocation4 + $0x1], 1 }

// kernel: vit_forward.5
= control target key start
LH: loop header
LB: loop body
LE: loop exit
PB: predicated region body
PF: predicated region fallthrough
CT: control target
= control target key end

     0   :  { %s1825_s29 = smov 0   ;;  %s2021_s0 = inlined_call_operand.vmem [shape: bf16[32,32], index: 0, kind: input, shape index: {}]   ;;  %s2022_s1 = inlined_call_operand.vmem [shape: f32[16,16], index: 1, kind: input, shape index: {}]   ;;  %s2023_s2 = inlined_call_operand.vmem [shape: bf16[32,96], index: 2, kind: input, shape index: {}]   ;;  %s2024_s3 = inlined_call_operand.vmem [shape: f32[1,96], index: 3, kind: input, shape index: {}]   ;;  %s2025_s4 = inlined_call_operand.vmem [shape: bf16[32,32], index: 4, kind: input, shape index: {}]   ;;  %s2026_s5 = inlined_call_operand.vmem [shape: f32[1,32], index: 5, kind: input, shape index: {}]   ;;  %s2027_s6 = inlined_call_operand.vmem [shape: f32[1,32], index: 6, kind: input, shape index: {}]   ;;  %s2028_s7 = inlined_call_operand.vmem [shape: f32[1,32], index: 7, kind: input, shape index: {}]   ;;  %s2029_s8 = inlined_call_operand.vmem [shape: bf16[32,64], index: 8, kind: input, shape index: {}]   ;;  %s2030_s9 = inlined_call_operand.vmem [shape: f32[1,64], index: 9, kind: input, shape index: {}]   ;;  %s2031_s10 = inlined_call_operand.vmem [shape: bf16[64,32], index: 10, kind: input, shape index: {}]   ;;  %s2032_s11 = inlined_call_operand.vmem [shape: f32[1,32], index: 11, kind: input, shape index: {}]   ;;  %s2033_s12 = inlined_call_operand.vmem [shape: f32[1,32], index: 12, kind: input, shape index: {}]   ;;  %s2034_s13 = inlined_call_operand.vmem [shape: f32[1,32], index: 13, kind: input, shape index: {}]   ;;  %s2035_s14 = inlined_call_operand.vmem [shape: bf16[32,32], index: 14, kind: output, shape index: {}]  }
   0x1 LB: > { %s1475_s30 = sadd.s32 4294967295, %s1732_s29   ;;  %p1479_p0 = scmp.ge.s32.totalorder %s1732_s29, 1  ;;  %s1732_s29 = sphi %s1825_s29, %s24_s29  }
   0x2   : > { %p413_p1 = scmp.lt.s32.totalorder %s1732_s29, 3 }
   0x4   : > { %p414_p2 = pnand %p1479_p0, %p413_p1 }
   0x5   : > { %s1480_s19 = sshll.u32 (!%p414_p2), %s1475_s30, 1  ;;  %s1736_s26 = smov (!%p414_p2), 120  }
   0x6   : > { %417 = sbr.rel (%p414_p2) target bundleno = 2195 (0x893), region = 76  ;;  %p460_p3 = scmp.lt.s32.totalorder (!%p414_p2), %s1480_s19, 3 }
   0x7   : > { %s1737_s27 = smov (!%p414_p2), 96   ;;  %s1738_s28 = smov (!%p414_p2), 80  }
   0x8   : > { %s1739_s30 = smov (!%p414_p2), 88   ;;  %s1740_s15 = smov (!%p414_p2), 72  }
   0x9   : > { %s1741_s16 = smov (!%p414_p2), 112   ;;  %s1742_s17 = smov (!%p414_p2), 104  }
   0xa   : > { %s1743_s24 = smov (!%p414_p2), 56   ;;  %s1744_s25 = smov (!%p414_p2), 64  }
   0xb   : > { %v1674_v0 = vld [vmem:[%s2023_s2 + $0x8] sm:$0xff]   ;;  %v1734_v1 = vmov 0.0   ;;  %v1675_v2 = vld [vmem:[%s2023_s2] sm:$0xff]   ;;  %vm1735_vm0 = vmmov 0   ;;  %s2037_s19 = smov (!%p460_p3, %s1480_s19), 3  ;;  %vm506_vm1 = vcmask 261120  }
   0xc   : > { %1551 = vmatprep.subr.bf16.mxu0 %v1734_v1  ;;  %1559 = vmatprep.subr.bf16.mxu1 %v1734_v1  ;;  %s1481_s20 = sshll.u32 %s2037_s19, 2  ;;  %v1484_v5 = vld [vmem:[%s2024_s3] ss:$0 sm:$0xff]  ;;  %vm555_vm2 = vcmask 64512   ;;  %vm607_vm3 = vcmask 130048   ;;  %v477_v29 = vld [vmem:[%s2022_s1 + $0x8] sm:$0xff] }
   0xd   : > { %1552 = vmatpush3.bf16.msra.mxu0 %v1674_v0  ;;  %1555 = vmatprep.mubr.msk.bf16.mxu0 %vm1735_vm0, %v1734_v1  ;;  %s463_s23 = scalar_lea.vmem %s2021_s0, %s1481_s20  ;;  %v476_v24 = vld [vmem:[%s2022_s1] sm:$0xff]  ;;  %s1748_s18 = smov 16   ;;  %vm1081_vm4 = vcmask 195584   ;;  %vm1313_vm5 = vcmask 523264   ;;  %vm1416_vm6 = vcmask 257024  }
   0xe   : > { %1553 = vmatprep.subr.bf16.mxu0 %v1734_v1  ;;  %1561 = vmatprep.mubr.msk.bf16.mxu1 %vm1735_vm0, %v1734_v1  ;;  %v1855_v3 = vld [vmem:[%s463_s23] sm:$0xff]   ;;  %s1749_s21 = smov 24  }
  0x11   : > { %1554 = vmatpush3.bf16.msra.mxu0 %v1675_v2 }
  0x12   : > { %1565 = vmatprep.subr.bf16.mxu0 %v1734_v1 }
  0x14   : > { %1556 = vmatmul.mubr.msk.bf16.vlgmr.msra.gmra.mxu0 %vm506_vm1, %v1855_v3 }
  0x15   : > { %1567 = vmatprep.mubr.msk.bf16.mxu0 %vm1735_vm0, %v1734_v1 }
  0xd4   : > { %v544_v4 = vpop.f32.mrf.mxu0 }
  0xd5   : > { %v545_v8 = vadd.f32 %v1484_v5, %v544_v4 }
  0xd6   : > { %v1557_v6 = vpop.f32.mrf.mxu0 }
  0xd8   : > { %v547_v7 = vpop.f32.mrf.mxu0 }
  0xd9   : > { %v548_v9 = vadd.f32 %v1484_v5, %v547_v7 }
  0xda   : > { %v1558_v10 = vpop.f32.mrf.mxu0 }
  0xdb   : > { %v1864_v11 = vpack.c.bf16 %v548_v9, %v545_v8 }
  0xdd   : > { %678 = vrot.lane.b32.xlu1 %v1864_v11, %s1736_s26  ;;  %553 = vrot.lane.b32.xlu0 %v1864_v11, %s1737_s27  ;;  %s1745_s26 = smov 48   ;;  %s1746_s27 = smov 40  }
  0xe1   : > { %805 = vrot.lane.b32.xlu1 %v1864_v11, %s1738_s28  ;;  %680 = vrot.lane.b32.xlu0 %v1864_v11, %s1739_s30 }
  0xe5   : > { %930 = vrot.lane.b32.xlu1 %v1864_v11, %s1740_s15  ;;  %803 = vrot.lane.b32.xlu0 %v1864_v11, %s1741_s16  ;;  %s1747_s15 = smov 8  }
  0xe9   : > { %928 = vrot.lane.b32.xlu0 %v1864_v11, %s1742_s17 }
 0x14f   : > { %v554_v12 = vpop.permute.xlu0 %553  ;;  %v679_v15 = vpop.permute.xlu1 %678 }
 0x150   : > { %v560_v13 = vsel %vm555_vm2, %v554_v12, 0 }
 0x151   : > { %1560 = vmatpush3.bf16.xpose.msra.mxu1 %v560_v13 }
 0x152   : > { %1571 = vmatprep.subr.bf16.mxu1 %v1734_v1 }
 0x153   : > { %v681_v14 = vpop.permute.xlu0 %680  ;;  %v806_v17 = vpop.permute.xlu1 %805 }
 0x154   : > { %v686_v16 = vsel %vm555_vm2, %v681_v14, 0  ;;  %v811_v18 = vsel %vm555_vm2, %v806_v17, 0 }
 0x157   : > { %v931_v19 = vpop.permute.xlu1 %930  ;;  %v804_v20 = vpop.permute.xlu0 %803 }
 0x158   : > { %1562 = vmatmul.mubr.msk.bf16.vlgmr.msra.gmra.mxu1 %vm555_vm2, %v1864_v11  ;;  %v936_v21 = vsel %vm555_vm2, %v931_v19, 0 }
 0x159   : > { %1572 = vmatpush3.bf16.xpose.msra.mxu1 %v686_v16  ;;  %1573 = vmatprep.mubr.msk.bf16.mxu1 %vm1735_vm0, %v1734_v1 }
 0x15a   : > { %1583 = vmatprep.subr.bf16.mxu1 %v1734_v1 }
 0x15b   : > { %v929_v22 = vpop.permute.xlu0 %928 }
 0x160   : > { %1574 = vmatmul.mubr.msk.bf16.vlgmr.msra.gmra.mxu1 %vm555_vm2, %v679_v15 }
 0x161   : > { %1584 = vmatpush3.bf16.xpose.msra.mxu1 %v811_v18  ;;  %1585 = vmatprep.mubr.msk.bf16.mxu1 %vm1735_vm0, %v1734_v1 }
 0x162   : > { %1595 = vmatprep.subr.bf16.mxu1 %v1734_v1 }
 0x168   : > { %1586 = vmatmul.mubr.msk.bf16.vlgmr.msra.gmra.mxu1 %vm555_vm2, %v804_v20 }
 0x169   : > { %1596 = vmatpush3.bf16.xpose.msra.mxu1 %v936_v21  ;;  %1597 = vmatprep.mubr.msk.bf16.mxu1 %vm1735_vm0, %v1734_v1 }
 0x16a   : > { %1607 = vmatprep.subr.bf16.mxu1 %v1734_v1 }
 0x170   : > { %1598 = vmatmul.mubr.msk.bf16.vlgmr.msra.gmra.mxu1 %vm555_vm2, %v929_v22 }
 0x171   : > { %1611 = vmatprep.mubr.msk.bf16.mxu1 %vm1735_vm0, %v1734_v1 }
 0x218   : > { %v596_v23 = vpop.f32.mrf.mxu1 }
 0x219   : > { %v603_v25 = vmul.f32 0.35355338, %v596_v23 }
 0x21a   : > { %v1563_v26 = vpop.f32.mrf.mxu1 }
 0x21b   : > { %v605_v27 = vadd.f32 %v603_v25, %v476_v24 }
 0x21c   : > { %v599_v28 = vpop.f32.mrf.mxu1 }
 0x21d   : > { %v604_v30 = vmul.f32 0.35355338, %v599_v28  ;;  %v608_v31 = vsel %vm607_vm3, %v605_v27, -inf }
 0x21e   : > { %609 = vmax.xlane.f32.xlu1 %v608_v31  ;;  %v1564_v32 = vpop.f32.mrf.mxu1 }
 0x21f   : > { %v606_v33 = vadd.f32 %v604_v30, %v477_v29 }
 0x220   : > { %v722_v34 = vpop.f32.mrf.mxu1 }
 0x221   : > { %v729_v35 = vmul.f32 0.35355338, %v722_v34  ;;  %v611_v36 = vsel %vm607_vm3, %v606_v33, -inf }
 0x222   : > { %612 = vmax.xlane.f32.xlu0 %v611_v36  ;;  %v1575_v37 = vpop.f32.mrf.mxu1 }
 0x223   : > { %v731_v38 = vadd.f32 %v729_v35, %v476_v24 }
 0x224   : > { %v725_v39 = vpop.f32.mrf.mxu1 }
 0x225   : > { %v730_v40 = vmul.f32 0.35355338, %v725_v39  ;;  %v733_v41 = vsel %vm607_vm3, %v731_v38, -inf }
 0x226   : > { %734 = vmax.xlane.f32.xlu0 %v733_v41  ;;  %v1576_v42 = vpop.f32.mrf.mxu1 }
 0x227   : > { %v732_v43 = vadd.f32 %v730_v40, %v477_v29 }
 0x228   : > { %v847_v44 = vpop.f32.mrf.mxu1 }
 0x229   : > { %v854_v45 = vmul.f32 0.35355338, %v847_v44  ;;  %v736_v46 = vsel %vm607_vm3, %v732_v43, -inf }
 0x22a   : > { %737 = vmax.xlane.f32.xlu1 %v736_v46  ;;  %v1587_v47 = vpop.f32.mrf.mxu1 }
 0x22b   : > { %v856_v48 = vadd.f32 %v854_v45, %v476_v24 }
 0x22c   : > { %v850_v49 = vpop.f32.mrf.mxu1 }
 0x22d   : > { %v855_v50 = vmul.f32 0.35355338, %v850_v49  ;;  %v858_v51 = vsel %vm607_vm3, %v856_v48, -inf }
 0x22e   : > { %859 = vmax.xlane.f32.xlu0 %v858_v51  ;;  %v1588_v52 = vpop.f32.mrf.mxu1 }
 0x22f   : > { %v857_v53 = vadd.f32 %v855_v50, %v477_v29 }
 0x230   : > { %v972_v54 = vpop.f32.mrf.mxu1 }
 0x231   : > { %v979_v55 = vmul.f32 0.35355338, %v972_v54  ;;  %v861_v56 = vsel %vm607_vm3, %v857_v53, -inf }
 0x232   : > { %862 = vmax.xlane.f32.xlu1 %v861_v56  ;;  %v1599_v57 = vpop.f32.mrf.mxu1 }
 0x233   : > { %v981_v58 = vadd.f32 %v979_v55, %v476_v24 }
 0x234   : > { %v975_v59 = vpop.f32.mrf.mxu1 }
 0x235   : > { %v980_v60 = vmul.f32 0.35355338, %v975_v59  ;;  %v983_v61 = vsel %vm607_vm3, %v981_v58, -inf }
 0x236   : > { %984 = vmax.xlane.f32.xlu0 %v983_v61  ;;  %v1600_v62 = vpop.f32.mrf.mxu1 }
 0x237   : > { %v982_v63 = vadd.f32 %v980_v60, %v477_v29 }
 0x239   : > { %v986_v0 = vsel %vm607_vm3, %v982_v63, -inf }
 0x23a   : > { %987 = vmax.xlane.f32.xlu1 %v986_v0 }
 0x2a7   : > { %v610_v2 = vpop.xlane.xlu1 %609 }
 0x2a8   : > { %v614_v4 = vsub.f32 %v605_v27, %v610_v2 }
 0x2aa   : > { %v616_v5 = vmul.f32 1.442695, %v614_v4 }
 0x2ab   : > { %v613_v6 = vpop.xlane.xlu0 %612 }
 0x2ac   : > { %1686 = vpow2.f32 %v616_v5  ;;  %v615_v7 = vsub.f32 %v606_v33, %v613_v6 }
 0x2ae   : > { %v618_v8 = vmul.f32 1.442695, %v615_v7 }
 0x2af   : > { %v735_v9 = vpop.xlane.xlu0 %734 }
 0x2b0   : > { %1688 = vpow2.f32 %v618_v8  ;;  %v739_v10 = vsub.f32 %v731_v38, %v735_v9 }
 0x2b2   : > { %v741_v12 = vmul.f32 1.442695, %v739_v10 }
 0x2b3   : > { %v738_v19 = vpop.xlane.xlu1 %737 }
 0x2b4   : > { %1690 = vpow2.f32 %v741_v12  ;;  %v740_v20 = vsub.f32 %v732_v43, %v738_v19 }
 0x2b6   : > { %v743_v24 = vmul.f32 1.442695, %v740_v20 }
 0x2b7   : > { %v860_v21 = vpop.xlane.xlu0 %859 }
 0x2b8   : > { %v864_v23 = vsub.f32 %v856_v48, %v860_v21  ;;  %1692 = vpow2.f32 %v743_v24  ;;  %v1677_v21 = vld [vmem:[%s2025_s4 + $0x8] sm:$0xff]  }
 0x2b9   : > { %v1687_v13 = vpop.eup %1686  ;;  %1608 = vmatpush3.bf16.msra.mxu1 %v1677_v21 }
 0x2ba   : > { %v620_v14 = vsel %vm607_vm3, %v1687_v13, 0.0  ;;  %v866_v28 = vmul.f32 1.442695, %v864_v23  ;;  %1609 = vmatprep.subr.bf16.mxu1 %v1734_v1 }
 0x2bb   : > { %621 = vadd.xlane.f32.xlu0 %v620_v14  ;;  %v863_v22 = vpop.xlane.xlu1 %862 }
 0x2bc   : > { %v865_v25 = vsub.f32 %v857_v53, %v863_v22  ;;  %1694 = vpow2.f32 %v866_v28 }
 0x2bd   : > { %v1689_v15 = vpop.eup %1688 }
 0x2be   : > { %v623_v16 = vsel %vm607_vm3, %v1689_v15, 0.0  ;;  %v868_v30 = vmul.f32 1.442695, %v865_v25 }
 0x2bf   : > { %624 = vadd.xlane.f32.xlu1 %v623_v16  ;;  %v985_v26 = vpop.xlane.xlu0 %984 }
 0x2c0   : > { %v989_v29 = vsub.f32 %v981_v58, %v985_v26  ;;  %1696 = vpow2.f32 %v868_v30  ;;  %v1678_v26 = vld [vmem:[%s2025_s4] sm:$0xff]  }
 0x2c1   : > { %v1910_v17 = vpop.eup %1690  ;;  %1610 = vmatpush3.bf16.msra.mxu1 %v1678_v26 }
 0x2c2   : > { %v745_v18 = vsel %vm607_vm3, %v1910_v17, 0.0  ;;  %v991_v32 = vmul.f32 1.442695, %v989_v29  ;;  %1623 = vmatprep.subr.bf16.mxu1 %v1734_v1 }
 0x2c3   : > { %746 = vadd.xlane.f32.xlu0 %v745_v18  ;;  %v988_v27 = vpop.xlane.xlu1 %987 }
 0x2c4   : > { %v990_v31 = vsub.f32 %v982_v63, %v988_v27  ;;  %1698 = vpow2.f32 %v991_v32 }
 0x2c5   : > { %v1693_v34 = vpop.eup %1692 }
 0x2c6   : > { %v993_v33 = vmul.f32 1.442695, %v990_v31  ;;  %v748_v36 = vsel %vm607_vm3, %v1693_v34, 0.0 }
 0x2c8   : > { %1700 = vpow2.f32 %v993_v33 }
 0x2c9   : > { %v1695_v35 = vpop.eup %1694 }
 0x2ca   : > { %v870_v40 = vsel %vm607_vm3, %v1695_v35, 0.0 }
 0x2cd   : > { %v1697_v37 = vpop.eup %1696 }
 0x2ce   : > { %v873_v39 = vsel %vm607_vm3, %v1697_v37, 0.0 }
 0x2d0   : > { %756 = vrot.lane.b32.xlu1 %v1864_v11, %s1743_s24  ;;  %s469_s24 = scalar_lea.vmem %s2035_s14, %s1481_s20 }
 0x2d1   : > { %v1917_v38 = vpop.eup %1698 }
 0x2d2   : > { %v995_v43 = vsel %vm607_vm3, %v1917_v38, 0.0 }
 0x2d5   : > { %v1701_v41 = vpop.eup %1700 }
 0x2d6   : > { %v998_v42 = vsel %vm607_vm3, %v1701_v41, 0.0 }
 0x2d9   : > { %631 = vrot.lane.b32.xlu0 %v1864_v11, %s1744_s25 }
 0x2f4   : > { %749 = vadd.xlane.f32.xlu1 %v748_v36 }
 0x2f8   : > { %874 = vadd.xlane.f32.xlu1 %v873_v39  ;;  %871 = vadd.xlane.f32.xlu0 %v870_v40 }
 0x2fc   : > { %999 = vadd.xlane.f32.xlu1 %v998_v42  ;;  %996 = vadd.xlane.f32.xlu0 %v995_v43 }
 0x30d   : > { %881 = vrot.lane.b32.xlu1 %v1864_v11, %s1745_s26 }
 0x312   : > { %1006 = vrot.lane.b32.xlu0 %v1864_v11, %s1746_s27 }
 0x344   : > { %v622_v44 = vpop.xlane.xlu0 %621 }
 0x345   : > { %1702 = vrcp.f32 %v622_v44 }
 0x348   : > { %v625_v45 = vpop.xlane.xlu1 %624 }
 0x349   : > { %1704 = vrcp.f32 %v625_v45 }
 0x34c   : > { %v747_v46 = vpop.xlane.xlu0 %746  ;;  %v757_v53 = vpop.permute.xlu1 %756 }
 0x34d   : > { %1706 = vrcp.f32 %v747_v46 }
 0x350   : > { %v632_v47 = vpop.permute.xlu0 %631 }
 0x351   : > { %1566 = vmatpush3.bf16.msra.mxu0 %v632_v47 }
 0x352   : > { %1577 = vmatprep.subr.bf16.mxu0 %v1734_v1  ;;  %v1703_v48 = vpop.eup %1702 }
 0x353   : > { %v628_v50 = vmul.f32 %v1703_v48, %v1687_v13 }
 0x356   : > { %v1705_v49 = vpop.eup %1704 }
 0x357   : > { %v629_v51 = vmul.f32 %v1705_v49, %v1689_v15 }
 0x359   : > { %v630_v52 = vpack.c.bf16 %v629_v51, %v628_v50  ;;  %v1497_v51 = vld [vmem:[%s2026_s5] ss:$0 sm:$0xff] }
 0x35a   : > { %v1707_v58 = vpop.eup %1706 }
 0x35b   : > { %1568 = vmatmul.mubr.msk.bf16.vlgmr.msra.gmra.mxu0 %vm607_vm3, %v630_v52  ;;  %v753_v60 = vmul.f32 %v1707_v58, %v1910_v17  ;;  %v474_v52 = vunpack.c.l.bf16 %v1855_v3 }
 0x35c   : > { %1578 = vmatpush3.bf16.msra.mxu0 %v757_v53  ;;  %1579 = vmatprep.mubr.msk.bf16.mxu0 %vm1735_vm0, %v1734_v1 }
 0x35d   : > { %1589 = vmatprep.subr.bf16.mxu0 %v1734_v1 }
 0x37d   : > { %v750_v11 = vpop.xlane.xlu1 %749 }
 0x37e   : > { %1708 = vrcp.f32 %v750_v11 }
 0x381   : > { %v875_v54 = vpop.xlane.xlu1 %874  ;;  %v872_v55 = vpop.xlane.xlu0 %871 }
 0x382   : > { %1710 = vrcp.f32 %v875_v54 }
 0x383   : > { %1712 = vrcp.f32 %v872_v55 }
 0x385   : > { %v1000_v56 = vpop.xlane.xlu1 %999  ;;  %v997_v57 = vpop.xlane.xlu0 %996 }
 0x386   : > { %1714 = vrcp.f32 %v1000_v56  ;;  %v475_v56 = vunpack.c.h.bf16 %v1855_v3  ;;  %v1679_v3 = vld [vmem:[%s2029_s8 + $0x8] sm:$0xff]  }
 0x387   : > { %1716 = vrcp.f32 %v997_v57 }
 0x389   : > { %v882_v2 = vpop.permute.xlu1 %881  ;;  %v1007_v9 = vpop.permute.xlu0 %1006 }
 0x38b   : > { %v1709_v59 = vpop.eup %1708 }
 0x38c   : > { %v754_v61 = vmul.f32 %v1709_v59, %v1693_v34 }
 0x38e   : > { %v755_v62 = vpack.c.bf16 %v754_v61, %v753_v60 }
 0x38f   : > { %v1711_v63 = vpop.eup %1710 }
 0x390   : > { %v1713_v0 = vpop.eup %1712  ;;  %1580 = vmatmul.mubr.msk.bf16.vlgmr.msra.gmra.mxu0 %vm607_vm3, %v755_v62  ;;  %v879_v5 = vmul.f32 %v1711_v63, %v1697_v37 }
 0x391   : > { %1590 = vmatpush3.bf16.msra.mxu0 %v882_v2  ;;  %1591 = vmatprep.mubr.msk.bf16.mxu0 %vm1735_vm0, %v1734_v1  ;;  %v878_v4 = vmul.f32 %v1713_v0, %v1695_v35 }
 0x392   : > { %1601 = vmatprep.subr.bf16.mxu0 %v1734_v1 }
 0x393   : > { %v1715_v6 = vpop.eup %1714  ;;  %v880_v7 = vpack.c.bf16 %v879_v5, %v878_v4  ;;  %v1680_v5 = vld [vmem:[%s2029_s8] sm:$0xff]  }
 0x394   : > { %v1717_v8 = vpop.eup %1716  ;;  %v1004_v12 = vmul.f32 %v1715_v6, %v1701_v41  ;;  %v1681_v6 = vld [vmem:[%s2031_s10 + $0x18] sm:$0xff]  }
 0x395   : > { %v1003_v10 = vmul.f32 %v1717_v8, %v1917_v38 }
 0x397   : > { %v1005_v13 = vpack.c.bf16 %v1004_v12, %v1003_v10 }
 0x398   : > { %1592 = vmatmul.mubr.msk.bf16.vlgmr.msra.gmra.mxu0 %vm607_vm3, %v880_v7 }
 0x399   : > { %1602 = vmatpush3.bf16.msra.mxu0 %v1007_v9  ;;  %1603 = vmatprep.mubr.msk.bf16.mxu0 %vm1735_vm0, %v1734_v1 }
 0x39a   : > { %1615 = vmatprep.subr.bf16.mxu0 %v1734_v1 }
 0x3a0   : > { %1604 = vmatmul.mubr.msk.bf16.vlgmr.msra.gmra.mxu0 %vm607_vm3, %v1005_v13 }
 0x3a1   : > { %1619 = vmatprep.mubr.msk.bf16.mxu0 %vm1735_vm0, %v1734_v1  ;;  %1616 = vmatpush3.bf16.msra.mxu0 %v1679_v3 }
 0x3a2   : > { %1617 = vmatprep.subr.bf16.mxu0 %v1734_v1 }
 0x3a5   : > { %1618 = vmatpush3.bf16.msra.mxu0 %v1680_v5 }
 0x41b   : > { %v671_v14 = vpop.f32.mrf.mxu0 }
 0x41d   : > { %v1569_v15 = vpop.f32.mrf.mxu0 }
 0x41f   : > { %v674_v16 = vpop.f32.mrf.mxu0 }
 0x421   : > { %v1570_v17 = vpop.f32.mrf.mxu0 }
 0x450   : > { %v796_v18 = vpop.f32.mrf.mxu0 }
 0x452   : > { %v1581_v19 = vpop.f32.mrf.mxu0 }
 0x454   : > { %v799_v20 = vpop.f32.mrf.mxu0 }
 0x455   : > { %v1659_v22 = vpack.i.bf16 %v799_v20, %v796_v18 }
 0x456   : > { %v1582_v23 = vpop.f32.mrf.mxu0 }
 0x457   : > { %1660 = vrot.lane.b32.xlu1 %v1659_v22, %s1747_s15 }
 0x458   : > { %v921_v24 = vpop.f32.mrf.mxu0 }
 0x45a   : > { %v1593_v25 = vpop.f32.mrf.mxu0 }
 0x45b   : > { %v1501_v25 = vld [vmem:[%s2027_s6] ss:$0 sm:$0xff] }
 0x45c   : > { %v924_v27 = vpop.f32.mrf.mxu0 }
 0x45d   : > { %v1664_v28 = vpack.i.bf16 %v924_v27, %v921_v24 }
 0x45e   : > { %v1594_v29 = vpop.f32.mrf.mxu0 }
 0x45f   : > { %1665 = vrot.lane.b32.xlu0 %v1664_v28, %s1748_s18 }
 0x460   : > { %v1046_v30 = vpop.f32.mrf.mxu0 }
 0x462   : > { %v1605_v31 = vpop.f32.mrf.mxu0 }
 0x464   : > { %v1049_v32 = vpop.f32.mrf.mxu0 }
 0x465   : > { %v1669_v33 = vpack.i.bf16 %v1049_v32, %v1046_v30  ;;  %v1502_v30 = vld [vmem:[%s2028_s7] ss:$0 sm:$0xff] }
 0x466   : > { %v1606_v34 = vpop.f32.mrf.mxu0 }
 0x467   : > { %1670 = vrot.lane.b32.xlu1 %v1669_v33, %s1749_s21 }
 0x4c9   : > { %v1661_v35 = vpop.permute.xlu1 %1660 }
 0x4ca   : > { %v1663_v37 = vunpack.i.h.bf16 %v1661_v35  ;;  %v1662_v38 = vunpack.i.l.bf16 %v1661_v35  ;;  %v1682_v35 = vld [vmem:[%s2031_s10 + $0x10] sm:$0xff]  }
 0x4cc   : > { %v1078_v42 = vsel %vm555_vm2, %v674_v16, %v1663_v37  ;;  %v1077_v43 = vsel %vm555_vm2, %v671_v14, %v1662_v38  ;;  %v1684_v37 = vld [vmem:[%s2031_s10] sm:$0xff]  }
 0x4cd   : > { %v1503_v38 = vld [vmem:[%s2030_s9] ss:$0 sm:$0xff] }
 0x4d1   : > { %v1666_v36 = vpop.permute.xlu0 %1665 }
 0x4d2   : > { %v1668_v39 = vunpack.i.h.bf16 %v1666_v36  ;;  %v1667_v40 = vunpack.i.l.bf16 %v1666_v36  ;;  %v1683_v36 = vld [vmem:[%s2031_s10 + $0x8] sm:$0xff]  }
 0x4d4   : > { %v1080_v46 = vsel %vm607_vm3, %v1078_v42, %v1668_v39  ;;  %v1079_v47 = vsel %vm607_vm3, %v1077_v43, %v1667_v40 }
 0x4d9   : > { %v1671_v41 = vpop.permute.xlu1 %1670 }
 0x4da   : > { %v1673_v44 = vunpack.i.h.bf16 %v1671_v41  ;;  %v1672_v45 = vunpack.i.l.bf16 %v1671_v41 }
 0x4dc   : > { %v1083_v48 = vsel %vm1081_vm4, %v1080_v46, %v1673_v44  ;;  %v1082_v49 = vsel %vm1081_vm4, %v1079_v47, %v1672_v45 }
 0x4dd   : > { %v1084_v50 = vpack.c.bf16 %v1083_v48, %v1082_v49 }
 0x4df   : > { %1612 = vmatmul.mubr.msk.bf16.vlgmr.msra.gmra.mxu1 %vm506_vm1, %v1084_v50 }
 0x4e0   : > { %1631 = vmatprep.mubr.msk.bf16.mxu1 %vm1735_vm0, %v1734_v1  ;;  %1624 = vmatpush3.bf16.msra.mxu1 %v1681_v6 }
 0x4e1   : > { %1625 = vmatprep.subr.bf16.mxu1 %v1734_v1 }
 0x4e4   : > { %1626 = vmatpush3.bf16.msra.mxu1 %v1682_v35 }
 0x4e5   : > { %1627 = vmatprep.subr.bf16.mxu1 %v1734_v1 }
 0x4e8   : > { %1628 = vmatpush3.bf16.msra.mxu1 %v1683_v36 }
 0x4e9   : > { %1629 = vmatprep.subr.bf16.mxu1 %v1734_v1  ;;  %v1507_v1 = vld [vmem:[%s2032_s11] ss:$0 sm:$0xff] }
 0x4ec   : > { %1630 = vmatpush3.bf16.msra.mxu1 %v1684_v37 }
 0x59f   : > { %v1145_v53 = vpop.f32.mrf.mxu1 }
 0x5a0   : > { %v1146_v11 = vadd.f32 %v1497_v51, %v1145_v53 }
 0x5a1   : > { %v1613_v54 = vpop.f32.mrf.mxu1 }
 0x5a2   : > { %v1152_v55 = vadd.f32 %v1146_v11, %v474_v52 }
 0x5a3   : > { %v1148_v57 = vpop.f32.mrf.mxu1 }
 0x5a4   : > { %v1149_v58 = vadd.f32 %v1497_v51, %v1148_v57  ;;  %v1156_v59 = vsel %vm506_vm1, %v1152_v55, 0.0  ;;  %v1165_v60 = vmul.f32 %v1152_v55, %v1152_v55 }
 0x5a5   : > { %v1614_v61 = vpop.f32.mrf.mxu1  ;;  %1157 = vadd.xlane.f32.xlu0 %v1156_v59 }
 0x5a6   : > { %v1153_v62 = vadd.f32 %v1149_v58, %v475_v56  ;;  %v1167_v0 = vsel %vm506_vm1, %v1165_v60, 0.0 }
 0x5a8   : > { %v1159_v63 = vsel %vm506_vm1, %v1153_v62, 0.0  ;;  %v1166_v2 = vmul.f32 %v1153_v62, %v1153_v62 }
 0x5a9   : > { %1160 = vadd.xlane.f32.xlu1 %v1159_v63  ;;  %1168 = vadd.xlane.f32.xlu0 %v1167_v0 }
 0x5aa   : > { %v1170_v4 = vsel %vm506_vm1, %v1166_v2, 0.0 }
 0x5ad   : > { %1171 = vadd.xlane.f32.xlu0 %v1170_v4 }
 0x62e   : > { %v1158_v7 = vpop.xlane.xlu0 %1157 }
 0x62f   : > { %v1163_v8 = vmul.f32 0.03125, %v1158_v7 }
 0x631   : > { %v1175_v12 = vmul.f32 %v1163_v8, %v1163_v8  ;;  %v1179_v22 = vsub.f32 %v1152_v55, %v1163_v8 }
 0x632   : > { %v1161_v9 = vpop.xlane.xlu1 %1160  ;;  %v1169_v10 = vpop.xlane.xlu0 %1168 }
 0x633   : > { %v1164_v13 = vmul.f32 0.03125, %v1161_v9  ;;  %v1173_v14 = vmul.f32 0.03125, %v1169_v10 }
 0x635   : > { %v1177_v15 = vsub.f32 %v1173_v14, %v1175_v12  ;;  %v1176_v17 = vmul.f32 %v1164_v13, %v1164_v13  ;;  %v1180_v26 = vsub.f32 %v1153_v62, %v1164_v13 }
 0x636   : > { %v1172_v16 = vpop.xlane.xlu0 %1171 }
 0x637   : > { %v1181_v18 = vadd.f32 1e-05, %v1177_v15  ;;  %v1174_v19 = vmul.f32 0.03125, %v1172_v16  ;;  %v1513_v15 = vld [vmem:[%s2033_s12] ss:$0 sm:$0xff] }
 0x639   : > { %1718 = vrsqrt.f32 %v1181_v18  ;;  %v1178_v20 = vsub.f32 %v1174_v19, %v1176_v17  ;;  %v1514_v17 = vld [vmem:[%s2034_s13] ss:$0 sm:$0xff] }
 0x63b   : > { %v1182_v21 = vadd.f32 1e-05, %v1178_v20 }
 0x63d   : > { %1720 = vrsqrt.f32 %v1182_v21 }
 0x646   : > { %v1719_v23 = vpop.eup %1718 }
 0x647   : > { %v1185_v24 = vmul.f32 %v1719_v23, %v1179_v22 }
 0x649   : > { %v1193_v29 = vmul.f32 %v1501_v25, %v1185_v24 }
 0x64a   : > { %v1721_v27 = vpop.eup %1720 }
 0x64b   : > { %v1186_v28 = vmul.f32 %v1721_v27, %v1180_v26  ;;  %v1201_v32 = vadd.f32 %v1502_v30, %v1193_v29 }
 0x64d   : > { %v1194_v31 = vmul.f32 %v1501_v25, %v1186_v28 }
 0x64f   : > { %v1202_v33 = vadd.f32 %v1502_v30, %v1194_v31 }
 0x651   : > { %v1203_v34 = vpack.c.bf16 %v1202_v33, %v1201_v32 }
 0x653   : > { %1620 = vmatmul.mubr.msk.bf16.vlgmr.msra.gmra.mxu0 %vm506_vm1, %v1203_v34 }
 0x713   : > { %v1264_v39 = vpop.f32.mrf.mxu0 }
 0x714   : > { %v1265_v41 = vadd.f32 %v1503_v38, %v1264_v39 }
 0x715   : > { %v1621_v40 = vpop.f32.mrf.mxu0 }
 0x716   : > { %v1271_v45 = vmax.f32 %v1265_v41, 0.0 }
 0x717   : > { %v1267_v42 = vpop.f32.mrf.mxu0 }
 0x718   : > { %v1268_v43 = vadd.f32 %v1503_v38, %v1267_v42 }
 0x719   : > { %v1622_v44 = vpop.f32.mrf.mxu0 }
 0x71a   : > { %v1272_v46 = vmax.f32 %v1268_v43, 0.0 }
 0x71c   : > { %v1273_v47 = vpack.c.bf16 %v1272_v46, %v1271_v45 }
 0x71e   : > { %1632 = vmatmul.mubr.msk.bf16.vlgmr.msra.gmra.mxu1 %vm1313_vm5, %v1273_v47 }
 0x7de   : > { %v1351_v48 = vpop.f32.mrf.mxu1 }
 0x7df   : > { %v1352_v49 = vadd.f32 %v1507_v1, %v1351_v48 }
 0x7e0   : > { %v1633_v50 = vpop.f32.mrf.mxu1 }
 0x7e1   : > { %v1358_v51 = vadd.f32 %v1352_v49, %v1201_v32 }
 0x7e2   : > { %v1354_v52 = vpop.f32.mrf.mxu1 }
 0x7e3   : > { %v1355_v53 = vadd.f32 %v1507_v1, %v1354_v52  ;;  %v1362_v11 = vsel %vm506_vm1, %v1358_v51, 0.0  ;;  %v1370_v54 = vmul.f32 %v1358_v51, %v1358_v51 }
 0x7e4   : > { %1363 = vadd.xlane.f32.xlu1 %v1362_v11  ;;  %v1634_v55 = vpop.f32.mrf.mxu1 }
 0x7e5   : > { %v1359_v56 = vadd.f32 %v1355_v53, %v1202_v33  ;;  %v1372_v57 = vsel %vm506_vm1, %v1370_v54, 0.0 }
 0x7e7   : > { %v1365_v58 = vsel %vm506_vm1, %v1359_v56, 0.0  ;;  %v1371_v59 = vmul.f32 %v1359_v56, %v1359_v56 }
 0x7e8   : > { %1373 = vadd.xlane.f32.xlu1 %v1372_v57  ;;  %1366 = vadd.xlane.f32.xlu0 %v1365_v58 }
 0x7e9   : > { %v1375_v60 = vsel %vm506_vm1, %v1371_v59, 0.0 }
 0x7ec   : > { %1376 = vadd.xlane.f32.xlu0 %v1375_v60 }
 0x86d   : > { %v1364_v61 = vpop.xlane.xlu1 %1363 }
 0x86e   : > { %v1368_v62 = vmul.f32 0.03125, %v1364_v61 }
 0x870   : > { %v1380_v2 = vmul.f32 %v1368_v62, %v1368_v62  ;;  %v1384_v13 = vsub.f32 %v1358_v51, %v1368_v62 }
 0x871   : > { %v1374_v63 = vpop.xlane.xlu1 %1373  ;;  %v1367_v0 = vpop.xlane.xlu0 %1366 }
 0x872   : > { %v1378_v4 = vmul.f32 0.03125, %v1374_v63  ;;  %v1369_v3 = vmul.f32 0.03125, %v1367_v0 }
 0x874   : > { %v1382_v5 = vsub.f32 %v1378_v4, %v1380_v2  ;;  %v1381_v8 = vmul.f32 %v1369_v3, %v1369_v3  ;;  %v1385_v19 = vsub.f32 %v1359_v56, %v1369_v3 }
 0x875   : > { %v1377_v6 = vpop.xlane.xlu0 %1376 }
 0x876   : > { %v1386_v7 = vadd.f32 1e-05, %v1382_v5  ;;  %v1379_v9 = vmul.f32 0.03125, %v1377_v6 }
 0x878   : > { %1722 = vrsqrt.f32 %v1386_v7  ;;  %v1383_v10 = vsub.f32 %v1379_v9, %v1381_v8 }
 0x87a   : > { %v1387_v12 = vadd.f32 1e-05, %v1383_v10 }
 0x87c   : > { %1724 = vrsqrt.f32 %v1387_v12 }
 0x885   : > { %v1723_v14 = vpop.eup %1722 }
 0x886   : > { %v1390_v16 = vmul.f32 %v1723_v14, %v1384_v13 }
 0x888   : > { %v1398_v18 = vmul.f32 %v1513_v15, %v1390_v16 }
 0x889   : > { %v1725_v20 = vpop.eup %1724 }
 0x88a   : > { %v1406_v21 = vadd.f32 %v1514_v17, %v1398_v18  ;;  %v1391_v22 = vmul.f32 %v1725_v20, %v1385_v19 }
 0x88c   : > { %v1519_v23 = vpack.c.bf16 %v1406_v21, %v1406_v21  ;;  %v1399_v24 = vmul.f32 %v1513_v15, %v1391_v22 }
 0x88e   : > { %1417 = vst.msk [vmem:[%s469_s24] sm:$0xf] %vm1416_vm6, %v1519_v23  ;;  %v1407_v25 = vadd.f32 %v1514_v17, %v1399_v24 }
 0x890   : > { %v1520_v26 = vpack.c.bf16 %v1407_v25, %v1407_v25 }
 0x892   : > { %1418 = vst.msk [vmem:[%s469_s24 + $0x4] sm:$0xf] %vm1416_vm6, %v1520_v26 }
 0x893 PF: > { %s24_s29 = sadd.s32 1, %s1732_s29  }
 0x894   : > { %p21_p4 = scmp.ge.s32.totalorder %s24_s29, 4  }
 0x896   :  { %23 = sbr.rel (!%p21_p4) target bundleno = 1 (0x1), region = 106 }

</bundles_post_ra>
